<compile_context>
chip_gen: v5e
topology: v5e:2x2
jax: 0.10.0
libtpu: 0.0.40
codegen_flags: <defaults>
</compile_context>

<pallas_src>
import functools

import jax
import jax.numpy as jnp
import numpy as np
from jax.experimental import pallas as pl
from jax.experimental.pallas import tpu as pltpu


def _layernorm(x, w, b, eps=1e-5):
    # x: (rows, C) f32, w/b: (1, C) f32
    mu = jnp.mean(x, axis=-1, keepdims=True)
    var = jnp.mean((x - mu) ** 2, axis=-1, keepdims=True)
    return (x - mu) * jax.lax.rsqrt(var + eps) * w + b


def transformer_layer_kernel(
    x_ref,            # (rows, C)    rows = batch_tile * N
    wq_ref,           # (H, C, d)    per-head query weights (1/sqrt(d) folded in)
    wk_ref,           # (H, C, d)    per-head key weights
    wv_ref,           # (H, C, d)    per-head value weights
    wp_ref,           # (H, d, C)    per-head output-projection weights
    bp_ref,           # (1, C)       projection bias
    n1w_ref, n1b_ref,  # (1, C)      layernorm1 gamma/beta
    n2w_ref, n2b_ref,  # (1, C)      layernorm2 gamma/beta
    w1_ref,           # (C, Hmlp)    mlp fc1 weight
    b1_ref,           # (1, Hmlp)    mlp fc1 bias
    w2_ref,           # (Hmlp, C)    mlp fc2 weight
    b2_ref,           # (1, C)       mlp fc2 bias
    o_ref,            # (rows, C)    output
    *,
    num_heads: int,
    seq_len: int,
    compute_dtype,
):
    rows, c = x_ref.shape
    bt = rows // seq_len
    cd = compute_dtype

    x = x_ref[...].astype(jnp.float32)                        # residual stream (f32)

    # ---- norm1 ----
    x1 = _layernorm(x, n1w_ref[...], n1b_ref[...]).astype(cd)

    # ---- QKV projections, batched over heads: (H, rows, d) ----
    x1h = jnp.broadcast_to(x1[None], (num_heads, rows, c))
    q = jnp.einsum("hrc,hcd->hrd", x1h, wq_ref[...],
                   preferred_element_type=jnp.float32).astype(cd)
    k = jnp.einsum("hrc,hcd->hrd", x1h, wk_ref[...],
                   preferred_element_type=jnp.float32).astype(cd)
    v = jnp.einsum("hrc,hcd->hrd", x1h, wv_ref[...],
                   preferred_element_type=jnp.float32).astype(cd)

    # ---- attention, per sequence, heads batched (scores are (H, N, N)) ----
    ctx_parts = []
    for b in range(bt):
        rs = slice(b * seq_len, (b + 1) * seq_len)
        s = jnp.einsum("hnd,hmd->hnm", q[:, rs], k[:, rs],
                       preferred_element_type=jnp.float32)    # scale already in wq
        s = s - jnp.max(s, axis=-1, keepdims=True)
        e = jnp.exp(s)
        p = e * pl.reciprocal(jnp.sum(e, axis=-1, keepdims=True), approx=True)
        ctx_parts.append(jnp.einsum("hnm,hmd->hnd", p.astype(cd), v[:, rs],
                                    preferred_element_type=jnp.float32))
    ctx = ctx_parts[0] if bt == 1 else jnp.concatenate(ctx_parts, axis=1)  # (H, rows, d)

    # ---- output projection: per-head (d -> C) contraction, then sum heads ----
    proj = jnp.einsum("hrd,hdc->hrc", ctx.astype(cd), wp_ref[...],
                      preferred_element_type=jnp.float32)      # (H, rows, C)
    attn = jnp.sum(proj, axis=0) + bp_ref[...]                 # (rows, C) f32

    x = x + attn

    # ---- norm2 + MLP ----
    x2 = _layernorm(x, n2w_ref[...], n2b_ref[...]).astype(cd)
    h1 = jnp.dot(x2, w1_ref[...], preferred_element_type=jnp.float32) + b1_ref[...]
    h1 = jnp.maximum(h1, 0.0).astype(cd)
    h2 = jnp.dot(h1, w2_ref[...], preferred_element_type=jnp.float32) + b2_ref[...]

    # NOTE: with C < 128 (demo size) stores are masked partial-lane vst; at real
    # model sizes (C >= 512) the output last dim is lane-dense.
    o_ref[...] = (x + h2).astype(o_ref.dtype)


def _full_block_spec(shape, single_buffer):
    ndim = len(shape)
    index_map = lambda i, _n=ndim: (0,) * _n
    if single_buffer:
        # Constant index_map => block is never re-fetched across the grid;
        # single-buffer it to halve the resident-weight VMEM footprint.
        return pl.BlockSpec(shape, index_map, pipeline_mode=pl.Buffered(1))
    return pl.BlockSpec(shape, index_map)


def _split_heads_cols(w, num_heads):
    # w: (C_in, C_out) with per-head output columns [h*d:(h+1)*d]  ->  (H, C_in, d)
    c_in, c_out = w.shape
    d = c_out // num_heads
    return jnp.transpose(w.reshape(c_in, num_heads, d), (1, 0, 2))


def transformer_layer(x, params, num_heads, *, batch_tile=None,
                      compute_dtype=jnp.bfloat16, single_buffer_weights=True):
    """x: (B, N, C) float32.  params: dict of pre-transposed (in, out) weights."""
    B, N, C = x.shape
    assert C % num_heads == 0
    d = C // num_heads
    scale = d ** (-0.5)

    if batch_tile is None:
        # keep >= 2 grid steps when possible so megacore / v7x dual-TC gets work
        batch_tile = max(1, B // 2)
    while B % batch_tile:
        batch_tile -= 1
    rows = batch_tile * N

    cd = compute_dtype
    # Per-head weight layouts; scale folded into wq; matmul weights cast to bf16.
    wq_h = _split_heads_cols(params["wq"] * scale, num_heads).astype(cd)   # (H, C, d)
    wk_h = _split_heads_cols(params["wkv"][:, :C], num_heads).astype(cd)   # (H, C, d)
    wv_h = _split_heads_cols(params["wkv"][:, C:], num_heads).astype(cd)   # (H, C, d)
    wp_h = params["wp"].reshape(num_heads, d, C).astype(cd)                # (H, d, C)
    w1 = params["w1"].astype(cd)
    w2 = params["w2"].astype(cd)

    weight_args = (
        wq_h, wk_h, wv_h, wp_h, params["bp"],
        params["n1w"], params["n1b"], params["n2w"], params["n2b"],
        w1, params["b1"], w2, params["b2"],
    )

    # Present x as a 2-D (B*N, C) slab: lane/sublane friendly, folds rows into matmuls.
    x2d = x.reshape(B * N, C)

    kernel = functools.partial(
        transformer_layer_kernel,
        num_heads=num_heads, seq_len=N, compute_dtype=cd,
    )

    def run(single_buffer):
        in_specs = [pl.BlockSpec((rows, C), lambda i: (i, 0))]
        in_specs += [_full_block_spec(a.shape, single_buffer) for a in weight_args]
        out = pl.pallas_call(
            kernel,
            out_shape=jax.ShapeDtypeStruct((B * N, C), x.dtype),
            grid_spec=pltpu.PrefetchScalarGridSpec(
                num_scalar_prefetch=0,
                grid=(B // batch_tile,),
                in_specs=in_specs,
                out_specs=pl.BlockSpec((rows, C), lambda i: (i, 0)),
            ),
            compiler_params=pltpu.CompilerParams(
                dimension_semantics=("parallel",),
                vmem_limit_bytes=64 * 1024 * 1024,
            ),
        )(x2d, *weight_args)
        return out.reshape(B, N, C)

    if single_buffer_weights:
        try:
            out = run(True)
            jax.block_until_ready(out)
            return out
        except Exception:
            # pipeline_mode=pl.Buffered(1) not supported on this JAX build;
            # fall back to default (double-buffered) weight specs.
            pass
    return run(False)


def reference_layer(x, params, num_heads):
    """Pure-JAX reference of the PyTorch TransformerLayer.forward (y=None, mask=None)."""
    B, N, C = x.shape
    d = C // num_heads
    scale = d ** (-0.5)

    def ln(v, w, b, eps=1e-5):
        mu = jnp.mean(v, axis=-1, keepdims=True)
        var = jnp.mean((v - mu) ** 2, axis=-1, keepdims=True)
        return (v - mu) / jnp.sqrt(var + eps) * w + b

    x1 = ln(x, params["n1w"], params["n1b"])
    q = (x1 @ params["wq"]).reshape(B, N, num_heads, d)
    kv = (x1 @ params["wkv"]).reshape(B, N, 2, num_heads, d)
    k, v = kv[:, :, 0], kv[:, :, 1]
    att = jnp.einsum("bnhd,bmhd->bnmh", q, k) * scale
    att = jax.nn.softmax(att, axis=2)
    out = jnp.einsum("bnmh,bmhd->bnhd", att, v).reshape(B, N, C)
    out = out @ params["wp"] + params["bp"]
    x = x + out
    x2 = ln(x, params["n2w"], params["n2b"])
    h = jnp.maximum(x2 @ params["w1"] + params["b1"], 0.0)
    return x + (h @ params["w2"] + params["b2"])


if __name__ == "__main__":
    B, N, C = 4, 8, 32          # batch, seq, dim_self (= dim_ref, self-attention)
    num_heads = 4
    H = int(C * 4.0)            # mlp_ratio = 4.0

    key = jax.random.PRNGKey(0)
    ks = jax.random.split(key, 16)

    def init(k, shape, fan_in):
        # deterministic small init (~ PyTorch uniform(-1/sqrt(fan_in), 1/sqrt(fan_in)))
        bound = 1.0 / np.sqrt(fan_in)
        return jax.random.uniform(k, shape, jnp.float32, -bound, bound)

    # Weights stored pre-transposed as (in, out) so the layer computes x @ W.
    params = {
        "wq":  init(ks[0], (C, C), C),        # to_queries (bias=False)
        "wkv": init(ks[1], (C, 2 * C), C),    # to_keys_values (bias=False)
        "wp":  init(ks[2], (C, C), C),        # project weight
        "bp":  init(ks[3], (1, C), C),        # project bias
        "n1w": jnp.ones((1, C), jnp.float32),
        "n1b": jnp.zeros((1, C), jnp.float32),
        "n2w": jnp.ones((1, C), jnp.float32),
        "n2b": jnp.zeros((1, C), jnp.float32),
        "w1":  init(ks[4], (C, H), C),        # mlp fc1 weight
        "b1":  init(ks[5], (1, H), C),        # mlp fc1 bias
        "w2":  init(ks[6], (H, C), H),        # mlp fc2 weight
        "b2":  init(ks[7], (1, C), H),        # mlp fc2 bias
    }

    x = jax.random.normal(ks[8], (B, N, C), jnp.float32)

    # TODO(synk): the `mask` and cross-attention (`y`) arguments of forward() are not
    # implemented (the layer is exercised with y=None, mask=None, dropout=0).
    ref = reference_layer(x, params, num_heads)

    # f32 compute path: tight check (tolerance loosened slightly for the approximate
    # EUP softmax reciprocal).
    out_f32 = jax.block_until_ready(
        transformer_layer(x, params, num_heads, compute_dtype=jnp.float32))
    np.testing.assert_allclose(np.asarray(out_f32), np.asarray(ref),
                               atol=5e-3, rtol=5e-3)

    # bf16 matmul-input path (the performance configuration): looser check.
    out_bf16 = jax.block_until_ready(
        transformer_layer(x, params, num_heads, compute_dtype=jnp.bfloat16))
    np.testing.assert_allclose(np.asarray(out_bf16), np.asarray(ref),
                               atol=5e-2, rtol=5e-2)

    print("KERNEL_OK")
</pallas_src>

<mosaic_0001>
module attributes {stable_mosaic.version = 11 : i64} {
  func.func @transformer_layer_kernel(%arg0: i32, %arg1: memref<16x32xf32, #tpu.memory_space<vmem>>, %arg2: memref<4x32x8xf32, #tpu.memory_space<vmem>>, %arg3: memref<4x32x8xf32, #tpu.memory_space<vmem>>, %arg4: memref<4x32x8xf32, #tpu.memory_space<vmem>>, %arg5: memref<4x8x32xf32, #tpu.memory_space<vmem>>, %arg6: memref<1x32xf32, #tpu.memory_space<vmem>>, %arg7: memref<1x32xf32, #tpu.memory_space<vmem>>, %arg8: memref<1x32xf32, #tpu.memory_space<vmem>>, %arg9: memref<1x32xf32, #tpu.memory_space<vmem>>, %arg10: memref<1x32xf32, #tpu.memory_space<vmem>>, %arg11: memref<32x128xf32, #tpu.memory_space<vmem>>, %arg12: memref<1x128xf32, #tpu.memory_space<vmem>>, %arg13: memref<128x32xf32, #tpu.memory_space<vmem>>, %arg14: memref<1x32xf32, #tpu.memory_space<vmem>>, %arg15: memref<16x32xf32, #tpu.memory_space<vmem>>) attributes {dimension_semantics = [#tpu.dimension_semantics<parallel>], iteration_bounds = array<i64: 2>, scalar_prefetch = 0 : i64, scratch_operands = 0 : i64, tpu.core_type = #tpu.core_type<tc>, window_params = [{transform_indices = @transform_0, window_bounds = array<i64: 16, 32>}, {pipeline_mode = #tpu.pipeline_mode<synchronous>, transform_indices = @transform_1, window_bounds = array<i64: 4, 32, 8>}, {pipeline_mode = #tpu.pipeline_mode<synchronous>, transform_indices = @transform_2, window_bounds = array<i64: 4, 32, 8>}, {pipeline_mode = #tpu.pipeline_mode<synchronous>, transform_indices = @transform_3, window_bounds = array<i64: 4, 32, 8>}, {pipeline_mode = #tpu.pipeline_mode<synchronous>, transform_indices = @transform_4, window_bounds = array<i64: 4, 8, 32>}, {pipeline_mode = #tpu.pipeline_mode<synchronous>, transform_indices = @transform_5, window_bounds = array<i64: 1, 32>}, {pipeline_mode = #tpu.pipeline_mode<synchronous>, transform_indices = @transform_6, window_bounds = array<i64: 1, 32>}, {pipeline_mode = #tpu.pipeline_mode<synchronous>, transform_indices = @transform_7, window_bounds = array<i64: 1, 32>}, {pipeline_mode = #tpu.pipeline_mode<synchronous>, transform_indices = @transform_8, window_bounds = array<i64: 1, 32>}, {pipeline_mode = #tpu.pipeline_mode<synchronous>, transform_indices = @transform_9, window_bounds = array<i64: 1, 32>}, {pipeline_mode = #tpu.pipeline_mode<synchronous>, transform_indices = @transform_10, window_bounds = array<i64: 32, 128>}, {pipeline_mode = #tpu.pipeline_mode<synchronous>, transform_indices = @transform_11, window_bounds = array<i64: 1, 128>}, {pipeline_mode = #tpu.pipeline_mode<synchronous>, transform_indices = @transform_12, window_bounds = array<i64: 128, 32>}, {pipeline_mode = #tpu.pipeline_mode<synchronous>, transform_indices = @transform_13, window_bounds = array<i64: 1, 32>}, {transform_indices = @transform_14, window_bounds = array<i64: 16, 32>}]} {
    %c0 = arith.constant 0 : index
    %c0_0 = arith.constant 0 : index
    %0 = vector.load %arg1[%c0, %c0_0] : memref<16x32xf32, #tpu.memory_space<vmem>>, vector<16x32xf32>
    %c0_1 = arith.constant 0 : index
    %c0_2 = arith.constant 0 : index
    %1 = vector.load %arg7[%c0_1, %c0_2] : memref<1x32xf32, #tpu.memory_space<vmem>>, vector<1x32xf32>
    %c0_3 = arith.constant 0 : index
    %c0_4 = arith.constant 0 : index
    %2 = vector.load %arg8[%c0_3, %c0_4] : memref<1x32xf32, #tpu.memory_space<vmem>>, vector<1x32xf32>
    %cst = arith.constant dense<0.000000e+00> : vector<16xf32>
    %3 = vector.multi_reduction <add>, %0, %cst [1] : vector<16x32xf32> to vector<16xf32>
    %4 = vector.shape_cast %3 : vector<16xf32> to vector<16x1xf32>
    %cst_5 = arith.constant 3.200000e+01 : f32
    %5 = vector.broadcast %cst_5 : f32 to vector<16x1xf32>
    %6 = arith.divf %4, %5 : vector<16x1xf32>
    %7 = vector.broadcast %6 : vector<16x1xf32> to vector<16x32xf32>
    %8 = arith.subf %0, %7 : vector<16x32xf32>
    %9 = arith.mulf %8, %8 : vector<16x32xf32>
    %cst_6 = arith.constant dense<0.000000e+00> : vector<16xf32>
    %10 = vector.multi_reduction <add>, %9, %cst_6 [1] : vector<16x32xf32> to vector<16xf32>
    %11 = vector.shape_cast %10 : vector<16xf32> to vector<16x1xf32>
    %cst_7 = arith.constant 3.200000e+01 : f32
    %12 = vector.broadcast %cst_7 : f32 to vector<16x1xf32>
    %13 = arith.divf %11, %12 : vector<16x1xf32>
    %14 = vector.broadcast %6 : vector<16x1xf32> to vector<16x32xf32>
    %15 = arith.subf %0, %14 : vector<16x32xf32>
    %cst_8 = arith.constant 9.99999974E-6 : f32
    %16 = vector.broadcast %cst_8 : f32 to vector<16x1xf32>
    %17 = arith.addf %13, %16 : vector<16x1xf32>
    %18 = math.rsqrt %17 : vector<16x1xf32>
    %19 = vector.broadcast %18 : vector<16x1xf32> to vector<16x32xf32>
    %20 = arith.mulf %15, %19 : vector<16x32xf32>
    %21 = vector.broadcast %1 : vector<1x32xf32> to vector<16x32xf32>
    %22 = arith.mulf %20, %21 : vector<16x32xf32>
    %23 = vector.broadcast %2 : vector<1x32xf32> to vector<16x32xf32>
    %24 = arith.addf %22, %23 : vector<16x32xf32>
    %25 = vector.shape_cast %24 : vector<16x32xf32> to vector<1x16x32xf32>
    %26 = vector.shape_cast %25 : vector<1x16x32xf32> to vector<1x16x32xf32>
    %27 = vector.broadcast %26 : vector<1x16x32xf32> to vector<4x16x32xf32>
    %c0_9 = arith.constant 0 : index
    %c0_10 = arith.constant 0 : index
    %c0_11 = arith.constant 0 : index
    %28 = vector.load %arg2[%c0_9, %c0_10, %c0_11] : memref<4x32x8xf32, #tpu.memory_space<vmem>>, vector<4x32x8xf32>
    "tpu.trace_start"() <{level = 10 : i32, message = "hrc,hcd->hrd"}> : () -> ()
    %cst_12 = arith.constant dense<0.000000e+00> : vector<4x16x8xf32>
    %29 = tpu.matmul %27, %28, %cst_12 {dimension_numbers = #tpu.dot_dimension_numbers<[2], [1], [1], [2], [0, 0, 0, 1, 1, 2], [0], [0]>} : vector<4x16x32xf32>, vector<4x32x8xf32>, vector<4x16x8xf32> -> vector<4x16x8xf32>
    "tpu.trace_stop"() : () -> ()
    %c0_13 = arith.constant 0 : index
    %c0_14 = arith.constant 0 : index
    %c0_15 = arith.constant 0 : index
    %30 = vector.load %arg3[%c0_13, %c0_14, %c0_15] : memref<4x32x8xf32, #tpu.memory_space<vmem>>, vector<4x32x8xf32>
    "tpu.trace_start"() <{level = 10 : i32, message = "hrc,hcd->hrd"}> : () -> ()
    %cst_16 = arith.constant dense<0.000000e+00> : vector<4x16x8xf32>
    %31 = tpu.matmul %27, %30, %cst_16 {dimension_numbers = #tpu.dot_dimension_numbers<[2], [1], [1], [2], [0, 0, 0, 1, 1, 2], [0], [0]>} : vector<4x16x32xf32>, vector<4x32x8xf32>, vector<4x16x8xf32> -> vector<4x16x8xf32>
    "tpu.trace_stop"() : () -> ()
    %c0_17 = arith.constant 0 : index
    %c0_18 = arith.constant 0 : index
    %c0_19 = arith.constant 0 : index
    %32 = vector.load %arg4[%c0_17, %c0_18, %c0_19] : memref<4x32x8xf32, #tpu.memory_space<vmem>>, vector<4x32x8xf32>
    "tpu.trace_start"() <{level = 10 : i32, message = "hrc,hcd->hrd"}> : () -> ()
    %cst_20 = arith.constant dense<0.000000e+00> : vector<4x16x8xf32>
    %33 = tpu.matmul %27, %32, %cst_20 {dimension_numbers = #tpu.dot_dimension_numbers<[2], [1], [1], [2], [0, 0, 0, 1, 1, 2], [0], [0]>} : vector<4x16x32xf32>, vector<4x32x8xf32>, vector<4x16x8xf32> -> vector<4x16x8xf32>
    "tpu.trace_stop"() : () -> ()
    %34 = vector.extract_strided_slice %29 {offsets = [0, 0, 0], sizes = [4, 8, 8], strides = [1, 1, 1]} : vector<4x16x8xf32> to vector<4x8x8xf32>
    %35 = vector.extract_strided_slice %31 {offsets = [0, 0, 0], sizes = [4, 8, 8], strides = [1, 1, 1]} : vector<4x16x8xf32> to vector<4x8x8xf32>
    "tpu.trace_start"() <{level = 10 : i32, message = "hnd,hmd->hnm"}> : () -> ()
    %cst_21 = arith.constant dense<0.000000e+00> : vector<4x8x8xf32>
    %36 = tpu.matmul %34, %35, %cst_21 {dimension_numbers = #tpu.dot_dimension_numbers<[2], [2], [1], [1], [0, 0, 0, 1, 1, 1], [0], [0]>} : vector<4x8x8xf32>, vector<4x8x8xf32>, vector<4x8x8xf32> -> vector<4x8x8xf32>
    "tpu.trace_stop"() : () -> ()
    %cst_22 = arith.constant dense<0xFF800000> : vector<4x8xf32>
    %37 = vector.multi_reduction <maximumf>, %36, %cst_22 [2] : vector<4x8x8xf32> to vector<4x8xf32>
    %38 = vector.shape_cast %37 : vector<4x8xf32> to vector<4x8x1xf32>
    %39 = vector.broadcast %38 : vector<4x8x1xf32> to vector<4x8x8xf32>
    %40 = arith.subf %36, %39 : vector<4x8x8xf32>
    %41 = math.exp %40 : vector<4x8x8xf32>
    %cst_23 = arith.constant dense<0.000000e+00> : vector<4x8xf32>
    %42 = vector.multi_reduction <add>, %41, %cst_23 [2] : vector<4x8x8xf32> to vector<4x8xf32>
    %43 = vector.shape_cast %42 : vector<4x8xf32> to vector<4x8x1xf32>
    %44 = tpu.reciprocal %43 {approx = true} : vector<4x8x1xf32> -> vector<4x8x1xf32>
    %45 = vector.broadcast %44 : vector<4x8x1xf32> to vector<4x8x8xf32>
    %46 = arith.mulf %41, %45 : vector<4x8x8xf32>
    %47 = vector.extract_strided_slice %33 {offsets = [0, 0, 0], sizes = [4, 8, 8], strides = [1, 1, 1]} : vector<4x16x8xf32> to vector<4x8x8xf32>
    "tpu.trace_start"() <{level = 10 : i32, message = "hnm,hmd->hnd"}> : () -> ()
    %cst_24 = arith.constant dense<0.000000e+00> : vector<4x8x8xf32>
    %48 = tpu.matmul %46, %47, %cst_24 {dimension_numbers = #tpu.dot_dimension_numbers<[2], [1], [1], [2], [0, 0, 0, 1, 1, 2], [0], [0]>} : vector<4x8x8xf32>, vector<4x8x8xf32>, vector<4x8x8xf32> -> vector<4x8x8xf32>
    "tpu.trace_stop"() : () -> ()
    %49 = vector.extract_strided_slice %29 {offsets = [0, 8, 0], sizes = [4, 8, 8], strides = [1, 1, 1]} : vector<4x16x8xf32> to vector<4x8x8xf32>
    %50 = vector.extract_strided_slice %31 {offsets = [0, 8, 0], sizes = [4, 8, 8], strides = [1, 1, 1]} : vector<4x16x8xf32> to vector<4x8x8xf32>
    "tpu.trace_start"() <{level = 10 : i32, message = "hnd,hmd->hnm"}> : () -> ()
    %cst_25 = arith.constant dense<0.000000e+00> : vector<4x8x8xf32>
    %51 = tpu.matmul %49, %50, %cst_25 {dimension_numbers = #tpu.dot_dimension_numbers<[2], [2], [1], [1], [0, 0, 0, 1, 1, 1], [0], [0]>} : vector<4x8x8xf32>, vector<4x8x8xf32>, vector<4x8x8xf32> -> vector<4x8x8xf32>
    "tpu.trace_stop"() : () -> ()
    %cst_26 = arith.constant dense<0xFF800000> : vector<4x8xf32>
    %52 = vector.multi_reduction <maximumf>, %51, %cst_26 [2] : vector<4x8x8xf32> to vector<4x8xf32>
    %53 = vector.shape_cast %52 : vector<4x8xf32> to vector<4x8x1xf32>
    %54 = vector.broadcast %53 : vector<4x8x1xf32> to vector<4x8x8xf32>
    %55 = arith.subf %51, %54 : vector<4x8x8xf32>
    %56 = math.exp %55 : vector<4x8x8xf32>
    %cst_27 = arith.constant dense<0.000000e+00> : vector<4x8xf32>
    %57 = vector.multi_reduction <add>, %56, %cst_27 [2] : vector<4x8x8xf32> to vector<4x8xf32>
    %58 = vector.shape_cast %57 : vector<4x8xf32> to vector<4x8x1xf32>
    %59 = tpu.reciprocal %58 {approx = true} : vector<4x8x1xf32> -> vector<4x8x1xf32>
    %60 = vector.broadcast %59 : vector<4x8x1xf32> to vector<4x8x8xf32>
    %61 = arith.mulf %56, %60 : vector<4x8x8xf32>
    %62 = vector.extract_strided_slice %33 {offsets = [0, 8, 0], sizes = [4, 8, 8], strides = [1, 1, 1]} : vector<4x16x8xf32> to vector<4x8x8xf32>
    "tpu.trace_start"() <{level = 10 : i32, message = "hnm,hmd->hnd"}> : () -> ()
    %cst_28 = arith.constant dense<0.000000e+00> : vector<4x8x8xf32>
    %63 = tpu.matmul %61, %62, %cst_28 {dimension_numbers = #tpu.dot_dimension_numbers<[2], [1], [1], [2], [0, 0, 0, 1, 1, 2], [0], [0]>} : vector<4x8x8xf32>, vector<4x8x8xf32>, vector<4x8x8xf32> -> vector<4x8x8xf32>
    "tpu.trace_stop"() : () -> ()
    %64 = tpu.concatenate %48, %63 in 1 : vector<4x8x8xf32>, vector<4x8x8xf32> -> vector<4x16x8xf32>
    %c0_29 = arith.constant 0 : index
    %c0_30 = arith.constant 0 : index
    %c0_31 = arith.constant 0 : index
    %65 = vector.load %arg5[%c0_29, %c0_30, %c0_31] : memref<4x8x32xf32, #tpu.memory_space<vmem>>, vector<4x8x32xf32>
    "tpu.trace_start"() <{level = 10 : i32, message = "hrd,hdc->hrc"}> : () -> ()
    %cst_32 = arith.constant dense<0.000000e+00> : vector<4x16x32xf32>
    %66 = tpu.matmul %64, %65, %cst_32 {dimension_numbers = #tpu.dot_dimension_numbers<[2], [1], [1], [2], [0, 0, 0, 1, 1, 2], [0], [0]>} : vector<4x16x8xf32>, vector<4x8x32xf32>, vector<4x16x32xf32> -> vector<4x16x32xf32>
    "tpu.trace_stop"() : () -> ()
    %cst_33 = arith.constant dense<0.000000e+00> : vector<16x32xf32>
    %67 = vector.multi_reduction <add>, %66, %cst_33 [0] : vector<4x16x32xf32> to vector<16x32xf32>
    %c0_34 = arith.constant 0 : index
    %c0_35 = arith.constant 0 : index
    %68 = vector.load %arg6[%c0_34, %c0_35] : memref<1x32xf32, #tpu.memory_space<vmem>>, vector<1x32xf32>
    %69 = vector.broadcast %68 : vector<1x32xf32> to vector<16x32xf32>
    %70 = arith.addf %67, %69 : vector<16x32xf32>
    %71 = arith.addf %0, %70 : vector<16x32xf32>
    %c0_36 = arith.constant 0 : index
    %c0_37 = arith.constant 0 : index
    %72 = vector.load %arg9[%c0_36, %c0_37] : memref<1x32xf32, #tpu.memory_space<vmem>>, vector<1x32xf32>
    %c0_38 = arith.constant 0 : index
    %c0_39 = arith.constant 0 : index
    %73 = vector.load %arg10[%c0_38, %c0_39] : memref<1x32xf32, #tpu.memory_space<vmem>>, vector<1x32xf32>
    %cst_40 = arith.constant dense<0.000000e+00> : vector<16xf32>
    %74 = vector.multi_reduction <add>, %71, %cst_40 [1] : vector<16x32xf32> to vector<16xf32>
    %75 = vector.shape_cast %74 : vector<16xf32> to vector<16x1xf32>
    %cst_41 = arith.constant 3.200000e+01 : f32
    %76 = vector.broadcast %cst_41 : f32 to vector<16x1xf32>
    %77 = arith.divf %75, %76 : vector<16x1xf32>
    %78 = vector.broadcast %77 : vector<16x1xf32> to vector<16x32xf32>
    %79 = arith.subf %71, %78 : vector<16x32xf32>
    %80 = arith.mulf %79, %79 : vector<16x32xf32>
    %cst_42 = arith.constant dense<0.000000e+00> : vector<16xf32>
    %81 = vector.multi_reduction <add>, %80, %cst_42 [1] : vector<16x32xf32> to vector<16xf32>
    %82 = vector.shape_cast %81 : vector<16xf32> to vector<16x1xf32>
    %cst_43 = arith.constant 3.200000e+01 : f32
    %83 = vector.broadcast %cst_43 : f32 to vector<16x1xf32>
    %84 = arith.divf %82, %83 : vector<16x1xf32>
    %85 = vector.broadcast %77 : vector<16x1xf32> to vector<16x32xf32>
    %86 = arith.subf %71, %85 : vector<16x32xf32>
    %cst_44 = arith.constant 9.99999974E-6 : f32
    %87 = vector.broadcast %cst_44 : f32 to vector<16x1xf32>
    %88 = arith.addf %84, %87 : vector<16x1xf32>
    %89 = math.rsqrt %88 : vector<16x1xf32>
    %90 = vector.broadcast %89 : vector<16x1xf32> to vector<16x32xf32>
    %91 = arith.mulf %86, %90 : vector<16x32xf32>
    %92 = vector.broadcast %72 : vector<1x32xf32> to vector<16x32xf32>
    %93 = arith.mulf %91, %92 : vector<16x32xf32>
    %94 = vector.broadcast %73 : vector<1x32xf32> to vector<16x32xf32>
    %95 = arith.addf %93, %94 : vector<16x32xf32>
    %c0_45 = arith.constant 0 : index
    %c0_46 = arith.constant 0 : index
    %96 = vector.load %arg11[%c0_45, %c0_46] : memref<32x128xf32, #tpu.memory_space<vmem>>, vector<32x128xf32>
    %cst_47 = arith.constant dense<0.000000e+00> : vector<16x128xf32>
    %97 = tpu.matmul %95, %96, %cst_47 {dimension_numbers = #tpu.dot_dimension_numbers<[1], [0], [0], [1], [0, 0, 1, 1], [], []>} : vector<16x32xf32>, vector<32x128xf32>, vector<16x128xf32> -> vector<16x128xf32>
    %c0_48 = arith.constant 0 : index
    %c0_49 = arith.constant 0 : index
    %98 = vector.load %arg12[%c0_48, %c0_49] : memref<1x128xf32, #tpu.memory_space<vmem>>, vector<1x128xf32>
    %99 = vector.broadcast %98 : vector<1x128xf32> to vector<16x128xf32>
    %100 = arith.addf %97, %99 : vector<16x128xf32>
    %cst_50 = arith.constant 0.000000e+00 : f32
    %101 = vector.broadcast %cst_50 : f32 to vector<16x128xf32>
    %102 = arith.maximumf %100, %101 : vector<16x128xf32>
    %c0_51 = arith.constant 0 : index
    %c0_52 = arith.constant 0 : index
    %103 = vector.load %arg13[%c0_51, %c0_52] : memref<128x32xf32, #tpu.memory_space<vmem>>, vector<128x32xf32>
    %cst_53 = arith.constant dense<0.000000e+00> : vector<16x32xf32>
    %104 = tpu.matmul %102, %103, %cst_53 {dimension_numbers = #tpu.dot_dimension_numbers<[1], [0], [0], [1], [0, 0, 1, 1], [], []>} : vector<16x128xf32>, vector<128x32xf32>, vector<16x32xf32> -> vector<16x32xf32>
    %c0_54 = arith.constant 0 : index
    %c0_55 = arith.constant 0 : index
    %105 = vector.load %arg14[%c0_54, %c0_55] : memref<1x32xf32, #tpu.memory_space<vmem>>, vector<1x32xf32>
    %106 = vector.broadcast %105 : vector<1x32xf32> to vector<16x32xf32>
    %107 = arith.addf %104, %106 : vector<16x32xf32>
    %108 = arith.addf %71, %107 : vector<16x32xf32>
    %c0_56 = arith.constant 0 : index
    %c0_57 = arith.constant 0 : index
    %109 = vector.load %arg15[%c0_56, %c0_57] : memref<16x32xf32, #tpu.memory_space<vmem>>, vector<16x32xf32>
    tpu.vector_store %arg15[%c0_56, %c0_57], %108 {strides = array<i32>} : memref<16x32xf32, #tpu.memory_space<vmem>>, vector<16x32xf32>,
    return
  }
  func.func @transform_0(%arg0: i32) -> (i32, i32) {
    %c0_i32 = arith.constant 0 : i32
    %c0_i32_0 = arith.constant 0 : i32
    return %arg0, %c0_i32 : i32, i32
  }
  func.func @transform_1(%arg0: i32) -> (i32, i32, i32) {
    %c0_i32 = arith.constant 0 : i32
    %c0_i32_0 = arith.constant 0 : i32
    %c0_i32_1 = arith.constant 0 : i32
    %c0_i32_2 = arith.constant 0 : i32
    return %c0_i32, %c0_i32_0, %c0_i32_1 : i32, i32, i32
  }
  func.func @transform_2(%arg0: i32) -> (i32, i32, i32) {
    %c0_i32 = arith.constant 0 : i32
    %c0_i32_0 = arith.constant 0 : i32
    %c0_i32_1 = arith.constant 0 : i32
    %c0_i32_2 = arith.constant 0 : i32
    return %c0_i32, %c0_i32_0, %c0_i32_1 : i32, i32, i32
  }
  func.func @transform_3(%arg0: i32) -> (i32, i32, i32) {
    %c0_i32 = arith.constant 0 : i32
    %c0_i32_0 = arith.constant 0 : i32
    %c0_i32_1 = arith.constant 0 : i32
    %c0_i32_2 = arith.constant 0 : i32
    return %c0_i32, %c0_i32_0, %c0_i32_1 : i32, i32, i32
  }
  func.func @transform_4(%arg0: i32) -> (i32, i32, i32) {
    %c0_i32 = arith.constant 0 : i32
    %c0_i32_0 = arith.constant 0 : i32
    %c0_i32_1 = arith.constant 0 : i32
    %c0_i32_2 = arith.constant 0 : i32
    return %c0_i32, %c0_i32_0, %c0_i32_1 : i32, i32, i32
  }
  func.func @transform_5(%arg0: i32) -> (i32, i32) {
    %c0_i32 = arith.constant 0 : i32
    %c0_i32_0 = arith.constant 0 : i32
    %c0_i32_1 = arith.constant 0 : i32
    return %c0_i32, %c0_i32_0 : i32, i32
  }
  func.func @transform_6(%arg0: i32) -> (i32, i32) {
    %c0_i32 = arith.constant 0 : i32
    %c0_i32_0 = arith.constant 0 : i32
    %c0_i32_1 = arith.constant 0 : i32
    return %c0_i32, %c0_i32_0 : i32, i32
  }
  func.func @transform_7(%arg0: i32) -> (i32, i32) {
    %c0_i32 = arith.constant 0 : i32
    %c0_i32_0 = arith.constant 0 : i32
    %c0_i32_1 = arith.constant 0 : i32
    return %c0_i32, %c0_i32_0 : i32, i32
  }
  func.func @transform_8(%arg0: i32) -> (i32, i32) {
    %c0_i32 = arith.constant 0 : i32
    %c0_i32_0 = arith.constant 0 : i32
    %c0_i32_1 = arith.constant 0 : i32
    return %c0_i32, %c0_i32_0 : i32, i32
  }
  func.func @transform_9(%arg0: i32) -> (i32, i32) {
    %c0_i32 = arith.constant 0 : i32
    %c0_i32_0 = arith.constant 0 : i32
    %c0_i32_1 = arith.constant 0 : i32
    return %c0_i32, %c0_i32_0 : i32, i32
  }
  func.func @transform_10(%arg0: i32) -> (i32, i32) {
    %c0_i32 = arith.constant 0 : i32
    %c0_i32_0 = arith.constant 0 : i32
    %c0_i32_1 = arith.constant 0 : i32
    return %c0_i32, %c0_i32_0 : i32, i32
  }
  func.func @transform_11(%arg0: i32) -> (i32, i32) {
    %c0_i32 = arith.constant 0 : i32
    %c0_i32_0 = arith.constant 0 : i32
    %c0_i32_1 = arith.constant 0 : i32
    return %c0_i32, %c0_i32_0 : i32, i32
  }
  func.func @transform_12(%arg0: i32) -> (i32, i32) {
    %c0_i32 = arith.constant 0 : i32
    %c0_i32_0 = arith.constant 0 : i32
    %c0_i32_1 = arith.constant 0 : i32
    return %c0_i32, %c0_i32_0 : i32, i32
  }
  func.func @transform_13(%arg0: i32) -> (i32, i32) {
    %c0_i32 = arith.constant 0 : i32
    %c0_i32_0 = arith.constant 0 : i32
    %c0_i32_1 = arith.constant 0 : i32
    return %c0_i32, %c0_i32_0 : i32, i32
  }
  func.func @transform_14(%arg0: i32) -> (i32, i32) {
    %c0_i32 = arith.constant 0 : i32
    %c0_i32_0 = arith.constant 0 : i32
    return %arg0, %c0_i32 : i32, i32
  }
}

module attributes {stable_mosaic.version = 11 : i64} {
  func.func @transformer_layer_kernel(%arg0: i32, %arg1: memref<16x32xf32, #tpu.memory_space<vmem>>, %arg2: memref<4x32x8xf32, #tpu.memory_space<vmem>>, %arg3: memref<4x32x8xf32, #tpu.memory_space<vmem>>, %arg4: memref<4x32x8xf32, #tpu.memory_space<vmem>>, %arg5: memref<4x8x32xf32, #tpu.memory_space<vmem>>, %arg6: memref<1x32xf32, #tpu.memory_space<vmem>>, %arg7: memref<1x32xf32, #tpu.memory_space<vmem>>, %arg8: memref<1x32xf32, #tpu.memory_space<vmem>>, %arg9: memref<1x32xf32, #tpu.memory_space<vmem>>, %arg10: memref<1x32xf32, #tpu.memory_space<vmem>>, %arg11: memref<32x128xf32, #tpu.memory_space<vmem>>, %arg12: memref<1x128xf32, #tpu.memory_space<vmem>>, %arg13: memref<128x32xf32, #tpu.memory_space<vmem>>, %arg14: memref<1x32xf32, #tpu.memory_space<vmem>>, %arg15: memref<16x32xf32, #tpu.memory_space<vmem>>) attributes {dimension_semantics = [#tpu.dimension_semantics<parallel>], iteration_bounds = array<i64: 2>, scalar_prefetch = 0 : i64, scratch_operands = 0 : i64, tpu.core_type = #tpu.core_type<tc>, window_params = [{transform_indices = @transform_0, window_bounds = array<i64: 16, 32>}, {pipeline_mode = #tpu.pipeline_mode<synchronous>, transform_indices = @transform_1, window_bounds = array<i64: 4, 32, 8>}, {pipeline_mode = #tpu.pipeline_mode<synchronous>, transform_indices = @transform_2, window_bounds = array<i64: 4, 32, 8>}, {pipeline_mode = #tpu.pipeline_mode<synchronous>, transform_indices = @transform_3, window_bounds = array<i64: 4, 32, 8>}, {pipeline_mode = #tpu.pipeline_mode<synchronous>, transform_indices = @transform_4, window_bounds = array<i64: 4, 8, 32>}, {pipeline_mode = #tpu.pipeline_mode<synchronous>, transform_indices = @transform_5, window_bounds = array<i64: 1, 32>}, {pipeline_mode = #tpu.pipeline_mode<synchronous>, transform_indices = @transform_6, window_bounds = array<i64: 1, 32>}, {pipeline_mode = #tpu.pipeline_mode<synchronous>, transform_indices = @transform_7, window_bounds = array<i64: 1, 32>}, {pipeline_mode = #tpu.pipeline_mode<synchronous>, transform_indices = @transform_8, window_bounds = array<i64: 1, 32>}, {pipeline_mode = #tpu.pipeline_mode<synchronous>, transform_indices = @transform_9, window_bounds = array<i64: 1, 32>}, {pipeline_mode = #tpu.pipeline_mode<synchronous>, transform_indices = @transform_10, window_bounds = array<i64: 32, 128>}, {pipeline_mode = #tpu.pipeline_mode<synchronous>, transform_indices = @transform_11, window_bounds = array<i64: 1, 128>}, {pipeline_mode = #tpu.pipeline_mode<synchronous>, transform_indices = @transform_12, window_bounds = array<i64: 128, 32>}, {pipeline_mode = #tpu.pipeline_mode<synchronous>, transform_indices = @transform_13, window_bounds = array<i64: 1, 32>}, {transform_indices = @transform_14, window_bounds = array<i64: 16, 32>}]} {
    %c0 = arith.constant 0 : index
    %c0_0 = arith.constant 0 : index
    %0 = vector.load %arg1[%c0, %c0_0] : memref<16x32xf32, #tpu.memory_space<vmem>>, vector<16x32xf32>
    %c0_1 = arith.constant 0 : index
    %c0_2 = arith.constant 0 : index
    %1 = vector.load %arg7[%c0_1, %c0_2] : memref<1x32xf32, #tpu.memory_space<vmem>>, vector<1x32xf32>
    %c0_3 = arith.constant 0 : index
    %c0_4 = arith.constant 0 : index
    %2 = vector.load %arg8[%c0_3, %c0_4] : memref<1x32xf32, #tpu.memory_space<vmem>>, vector<1x32xf32>
    %cst = arith.constant dense<0.000000e+00> : vector<16xf32>
    %3 = vector.multi_reduction <add>, %0, %cst [1] : vector<16x32xf32> to vector<16xf32>
    %4 = vector.shape_cast %3 : vector<16xf32> to vector<16x1xf32>
    %cst_5 = arith.constant 3.200000e+01 : f32
    %5 = vector.broadcast %cst_5 : f32 to vector<16x1xf32>
    %6 = arith.divf %4, %5 : vector<16x1xf32>
    %7 = vector.broadcast %6 : vector<16x1xf32> to vector<16x32xf32>
    %8 = arith.subf %0, %7 : vector<16x32xf32>
    %9 = arith.mulf %8, %8 : vector<16x32xf32>
    %cst_6 = arith.constant dense<0.000000e+00> : vector<16xf32>
    %10 = vector.multi_reduction <add>, %9, %cst_6 [1] : vector<16x32xf32> to vector<16xf32>
    %11 = vector.shape_cast %10 : vector<16xf32> to vector<16x1xf32>
    %cst_7 = arith.constant 3.200000e+01 : f32
    %12 = vector.broadcast %cst_7 : f32 to vector<16x1xf32>
    %13 = arith.divf %11, %12 : vector<16x1xf32>
    %14 = vector.broadcast %6 : vector<16x1xf32> to vector<16x32xf32>
    %15 = arith.subf %0, %14 : vector<16x32xf32>
    %cst_8 = arith.constant 9.99999974E-6 : f32
    %16 = vector.broadcast %cst_8 : f32 to vector<16x1xf32>
    %17 = arith.addf %13, %16 : vector<16x1xf32>
    %18 = math.rsqrt %17 : vector<16x1xf32>
    %19 = vector.broadcast %18 : vector<16x1xf32> to vector<16x32xf32>
    %20 = arith.mulf %15, %19 : vector<16x32xf32>
    %21 = vector.broadcast %1 : vector<1x32xf32> to vector<16x32xf32>
    %22 = arith.mulf %20, %21 : vector<16x32xf32>
    %23 = vector.broadcast %2 : vector<1x32xf32> to vector<16x32xf32>
    %24 = arith.addf %22, %23 : vector<16x32xf32>
    %25 = vector.shape_cast %24 : vector<16x32xf32> to vector<1x16x32xf32>
    %26 = vector.shape_cast %25 : vector<1x16x32xf32> to vector<1x16x32xf32>
    %27 = vector.broadcast %26 : vector<1x16x32xf32> to vector<4x16x32xf32>
    %c0_9 = arith.constant 0 : index
    %c0_10 = arith.constant 0 : index
    %c0_11 = arith.constant 0 : index
    %28 = vector.load %arg2[%c0_9, %c0_10, %c0_11] : memref<4x32x8xf32, #tpu.memory_space<vmem>>, vector<4x32x8xf32>
    "tpu.trace_start"() <{level = 10 : i32, message = "hrc,hcd->hrd"}> : () -> ()
    %cst_12 = arith.constant dense<0.000000e+00> : vector<4x16x8xf32>
    %29 = tpu.matmul %27, %28, %cst_12 {dimension_numbers = #tpu.dot_dimension_numbers<[2], [1], [1], [2], [0, 0, 0, 1, 1, 2], [0], [0]>} : vector<4x16x32xf32>, vector<4x32x8xf32>, vector<4x16x8xf32> -> vector<4x16x8xf32>
    "tpu.trace_stop"() : () -> ()
    %c0_13 = arith.constant 0 : index
    %c0_14 = arith.constant 0 : index
    %c0_15 = arith.constant 0 : index
    %30 = vector.load %arg3[%c0_13, %c0_14, %c0_15] : memref<4x32x8xf32, #tpu.memory_space<vmem>>, vector<4x32x8xf32>
    "tpu.trace_start"() <{level = 10 : i32, message = "hrc,hcd->hrd"}> : () -> ()
    %cst_16 = arith.constant dense<0.000000e+00> : vector<4x16x8xf32>
    %31 = tpu.matmul %27, %30, %cst_16 {dimension_numbers = #tpu.dot_dimension_numbers<[2], [1], [1], [2], [0, 0, 0, 1, 1, 2], [0], [0]>} : vector<4x16x32xf32>, vector<4x32x8xf32>, vector<4x16x8xf32> -> vector<4x16x8xf32>
    "tpu.trace_stop"() : () -> ()
    %c0_17 = arith.constant 0 : index
    %c0_18 = arith.constant 0 : index
    %c0_19 = arith.constant 0 : index
    %32 = vector.load %arg4[%c0_17, %c0_18, %c0_19] : memref<4x32x8xf32, #tpu.memory_space<vmem>>, vector<4x32x8xf32>
    "tpu.trace_start"() <{level = 10 : i32, message = "hrc,hcd->hrd"}> : () -> ()
    %cst_20 = arith.constant dense<0.000000e+00> : vector<4x16x8xf32>
    %33 = tpu.matmul %27, %32, %cst_20 {dimension_numbers = #tpu.dot_dimension_numbers<[2], [1], [1], [2], [0, 0, 0, 1, 1, 2], [0], [0]>} : vector<4x16x32xf32>, vector<4x32x8xf32>, vector<4x16x8xf32> -> vector<4x16x8xf32>
    "tpu.trace_stop"() : () -> ()
    %34 = vector.extract_strided_slice %29 {offsets = [0, 0, 0], sizes = [4, 8, 8], strides = [1, 1, 1]} : vector<4x16x8xf32> to vector<4x8x8xf32>
    %35 = vector.extract_strided_slice %31 {offsets = [0, 0, 0], sizes = [4, 8, 8], strides = [1, 1, 1]} : vector<4x16x8xf32> to vector<4x8x8xf32>
    "tpu.trace_start"() <{level = 10 : i32, message = "hnd,hmd->hnm"}> : () -> ()
    %cst_21 = arith.constant dense<0.000000e+00> : vector<4x8x8xf32>
    %36 = tpu.matmul %34, %35, %cst_21 {dimension_numbers = #tpu.dot_dimension_numbers<[2], [2], [1], [1], [0, 0, 0, 1, 1, 1], [0], [0]>} : vector<4x8x8xf32>, vector<4x8x8xf32>, vector<4x8x8xf32> -> vector<4x8x8xf32>
    "tpu.trace_stop"() : () -> ()
    %cst_22 = arith.constant dense<0xFF800000> : vector<4x8xf32>
    %37 = vector.multi_reduction <maximumf>, %36, %cst_22 [2] : vector<4x8x8xf32> to vector<4x8xf32>
    %38 = vector.shape_cast %37 : vector<4x8xf32> to vector<4x8x1xf32>
    %39 = vector.broadcast %38 : vector<4x8x1xf32> to vector<4x8x8xf32>
    %40 = arith.subf %36, %39 : vector<4x8x8xf32>
    %41 = math.exp %40 : vector<4x8x8xf32>
    %cst_23 = arith.constant dense<0.000000e+00> : vector<4x8xf32>
    %42 = vector.multi_reduction <add>, %41, %cst_23 [2] : vector<4x8x8xf32> to vector<4x8xf32>
    %43 = vector.shape_cast %42 : vector<4x8xf32> to vector<4x8x1xf32>
    %44 = tpu.reciprocal %43 {approx = true} : vector<4x8x1xf32> -> vector<4x8x1xf32>
    %45 = vector.broadcast %44 : vector<4x8x1xf32> to vector<4x8x8xf32>
    %46 = arith.mulf %41, %45 : vector<4x8x8xf32>
    %47 = vector.extract_strided_slice %33 {offsets = [0, 0, 0], sizes = [4, 8, 8], strides = [1, 1, 1]} : vector<4x16x8xf32> to vector<4x8x8xf32>
    "tpu.trace_start"() <{level = 10 : i32, message = "hnm,hmd->hnd"}> : () -> ()
    %cst_24 = arith.constant dense<0.000000e+00> : vector<4x8x8xf32>
    %48 = tpu.matmul %46, %47, %cst_24 {dimension_numbers = #tpu.dot_dimension_numbers<[2], [1], [1], [2], [0, 0, 0, 1, 1, 2], [0], [0]>} : vector<4x8x8xf32>, vector<4x8x8xf32>, vector<4x8x8xf32> -> vector<4x8x8xf32>
    "tpu.trace_stop"() : () -> ()
    %49 = vector.extract_strided_slice %29 {offsets = [0, 8, 0], sizes = [4, 8, 8], strides = [1, 1, 1]} : vector<4x16x8xf32> to vector<4x8x8xf32>
    %50 = vector.extract_strided_slice %31 {offsets = [0, 8, 0], sizes = [4, 8, 8], strides = [1, 1, 1]} : vector<4x16x8xf32> to vector<4x8x8xf32>
    "tpu.trace_start"() <{level = 10 : i32, message = "hnd,hmd->hnm"}> : () -> ()
    %cst_25 = arith.constant dense<0.000000e+00> : vector<4x8x8xf32>
    %51 = tpu.matmul %49, %50, %cst_25 {dimension_numbers = #tpu.dot_dimension_numbers<[2], [2], [1], [1], [0, 0, 0, 1, 1, 1], [0], [0]>} : vector<4x8x8xf32>, vector<4x8x8xf32>, vector<4x8x8xf32> -> vector<4x8x8xf32>
    "tpu.trace_stop"() : () -> ()
    %cst_26 = arith.constant dense<0xFF800000> : vector<4x8xf32>
    %52 = vector.multi_reduction <maximumf>, %51, %cst_26 [2] : vector<4x8x8xf32> to vector<4x8xf32>
    %53 = vector.shape_cast %52 : vector<4x8xf32> to vector<4x8x1xf32>
    %54 = vector.broadcast %53 : vector<4x8x1xf32> to vector<4x8x8xf32>
    %55 = arith.subf %51, %54 : vector<4x8x8xf32>
    %56 = math.exp %55 : vector<4x8x8xf32>
    %cst_27 = arith.constant dense<0.000000e+00> : vector<4x8xf32>
    %57 = vector.multi_reduction <add>, %56, %cst_27 [2] : vector<4x8x8xf32> to vector<4x8xf32>
    %58 = vector.shape_cast %57 : vector<4x8xf32> to vector<4x8x1xf32>
    %59 = tpu.reciprocal %58 {approx = true} : vector<4x8x1xf32> -> vector<4x8x1xf32>
    %60 = vector.broadcast %59 : vector<4x8x1xf32> to vector<4x8x8xf32>
    %61 = arith.mulf %56, %60 : vector<4x8x8xf32>
    %62 = vector.extract_strided_slice %33 {offsets = [0, 8, 0], sizes = [4, 8, 8], strides = [1, 1, 1]} : vector<4x16x8xf32> to vector<4x8x8xf32>
    "tpu.trace_start"() <{level = 10 : i32, message = "hnm,hmd->hnd"}> : () -> ()
    %cst_28 = arith.constant dense<0.000000e+00> : vector<4x8x8xf32>
    %63 = tpu.matmul %61, %62, %cst_28 {dimension_numbers = #tpu.dot_dimension_numbers<[2], [1], [1], [2], [0, 0, 0, 1, 1, 2], [0], [0]>} : vector<4x8x8xf32>, vector<4x8x8xf32>, vector<4x8x8xf32> -> vector<4x8x8xf32>
    "tpu.trace_stop"() : () -> ()
    %64 = tpu.concatenate %48, %63 in 1 : vector<4x8x8xf32>, vector<4x8x8xf32> -> vector<4x16x8xf32>
    %c0_29 = arith.constant 0 : index
    %c0_30 = arith.constant 0 : index
    %c0_31 = arith.constant 0 : index
    %65 = vector.load %arg5[%c0_29, %c0_30, %c0_31] : memref<4x8x32xf32, #tpu.memory_space<vmem>>, vector<4x8x32xf32>
    "tpu.trace_start"() <{level = 10 : i32, message = "hrd,hdc->hrc"}> : () -> ()
    %cst_32 = arith.constant dense<0.000000e+00> : vector<4x16x32xf32>
    %66 = tpu.matmul %64, %65, %cst_32 {dimension_numbers = #tpu.dot_dimension_numbers<[2], [1], [1], [2], [0, 0, 0, 1, 1, 2], [0], [0]>} : vector<4x16x8xf32>, vector<4x8x32xf32>, vector<4x16x32xf32> -> vector<4x16x32xf32>
    "tpu.trace_stop"() : () -> ()
    %cst_33 = arith.constant dense<0.000000e+00> : vector<16x32xf32>
    %67 = vector.multi_reduction <add>, %66, %cst_33 [0] : vector<4x16x32xf32> to vector<16x32xf32>
    %c0_34 = arith.constant 0 : index
    %c0_35 = arith.constant 0 : index
    %68 = vector.load %arg6[%c0_34, %c0_35] : memref<1x32xf32, #tpu.memory_space<vmem>>, vector<1x32xf32>
    %69 = vector.broadcast %68 : vector<1x32xf32> to vector<16x32xf32>
    %70 = arith.addf %67, %69 : vector<16x32xf32>
    %71 = arith.addf %0, %70 : vector<16x32xf32>
    %c0_36 = arith.constant 0 : index
    %c0_37 = arith.constant 0 : index
    %72 = vector.load %arg9[%c0_36, %c0_37] : memref<1x32xf32, #tpu.memory_space<vmem>>, vector<1x32xf32>
    %c0_38 = arith.constant 0 : index
    %c0_39 = arith.constant 0 : index
    %73 = vector.load %arg10[%c0_38, %c0_39] : memref<1x32xf32, #tpu.memory_space<vmem>>, vector<1x32xf32>
    %cst_40 = arith.constant dense<0.000000e+00> : vector<16xf32>
    %74 = vector.multi_reduction <add>, %71, %cst_40 [1] : vector<16x32xf32> to vector<16xf32>
    %75 = vector.shape_cast %74 : vector<16xf32> to vector<16x1xf32>
    %cst_41 = arith.constant 3.200000e+01 : f32
    %76 = vector.broadcast %cst_41 : f32 to vector<16x1xf32>
    %77 = arith.divf %75, %76 : vector<16x1xf32>
    %78 = vector.broadcast %77 : vector<16x1xf32> to vector<16x32xf32>
    %79 = arith.subf %71, %78 : vector<16x32xf32>
    %80 = arith.mulf %79, %79 : vector<16x32xf32>
    %cst_42 = arith.constant dense<0.000000e+00> : vector<16xf32>
    %81 = vector.multi_reduction <add>, %80, %cst_42 [1] : vector<16x32xf32> to vector<16xf32>
    %82 = vector.shape_cast %81 : vector<16xf32> to vector<16x1xf32>
    %cst_43 = arith.constant 3.200000e+01 : f32
    %83 = vector.broadcast %cst_43 : f32 to vector<16x1xf32>
    %84 = arith.divf %82, %83 : vector<16x1xf32>
    %85 = vector.broadcast %77 : vector<16x1xf32> to vector<16x32xf32>
    %86 = arith.subf %71, %85 : vector<16x32xf32>
    %cst_44 = arith.constant 9.99999974E-6 : f32
    %87 = vector.broadcast %cst_44 : f32 to vector<16x1xf32>
    %88 = arith.addf %84, %87 : vector<16x1xf32>
    %89 = math.rsqrt %88 : vector<16x1xf32>
    %90 = vector.broadcast %89 : vector<16x1xf32> to vector<16x32xf32>
    %91 = arith.mulf %86, %90 : vector<16x32xf32>
    %92 = vector.broadcast %72 : vector<1x32xf32> to vector<16x32xf32>
    %93 = arith.mulf %91, %92 : vector<16x32xf32>
    %94 = vector.broadcast %73 : vector<1x32xf32> to vector<16x32xf32>
    %95 = arith.addf %93, %94 : vector<16x32xf32>
    %c0_45 = arith.constant 0 : index
    %c0_46 = arith.constant 0 : index
    %96 = vector.load %arg11[%c0_45, %c0_46] : memref<32x128xf32, #tpu.memory_space<vmem>>, vector<32x128xf32>
    %cst_47 = arith.constant dense<0.000000e+00> : vector<16x128xf32>
    %97 = tpu.matmul %95, %96, %cst_47 {dimension_numbers = #tpu.dot_dimension_numbers<[1], [0], [0], [1], [0, 0, 1, 1], [], []>} : vector<16x32xf32>, vector<32x128xf32>, vector<16x128xf32> -> vector<16x128xf32>
    %c0_48 = arith.constant 0 : index
    %c0_49 = arith.constant 0 : index
    %98 = vector.load %arg12[%c0_48, %c0_49] : memref<1x128xf32, #tpu.memory_space<vmem>>, vector<1x128xf32>
    %99 = vector.broadcast %98 : vector<1x128xf32> to vector<16x128xf32>
    %100 = arith.addf %97, %99 : vector<16x128xf32>
    %cst_50 = arith.constant 0.000000e+00 : f32
    %101 = vector.broadcast %cst_50 : f32 to vector<16x128xf32>
    %102 = arith.maximumf %100, %101 : vector<16x128xf32>
    %c0_51 = arith.constant 0 : index
    %c0_52 = arith.constant 0 : index
    %103 = vector.load %arg13[%c0_51, %c0_52] : memref<128x32xf32, #tpu.memory_space<vmem>>, vector<128x32xf32>
    %cst_53 = arith.constant dense<0.000000e+00> : vector<16x32xf32>
    %104 = tpu.matmul %102, %103, %cst_53 {dimension_numbers = #tpu.dot_dimension_numbers<[1], [0], [0], [1], [0, 0, 1, 1], [], []>} : vector<16x128xf32>, vector<128x32xf32>, vector<16x32xf32> -> vector<16x32xf32>
    %c0_54 = arith.constant 0 : index
    %c0_55 = arith.constant 0 : index
    %105 = vector.load %arg14[%c0_54, %c0_55] : memref<1x32xf32, #tpu.memory_space<vmem>>, vector<1x32xf32>
    %106 = vector.broadcast %105 : vector<1x32xf32> to vector<16x32xf32>
    %107 = arith.addf %104, %106 : vector<16x32xf32>
    %108 = arith.addf %71, %107 : vector<16x32xf32>
    %c0_56 = arith.constant 0 : index
    %c0_57 = arith.constant 0 : index
    %109 = vector.load %arg15[%c0_56, %c0_57] : memref<16x32xf32, #tpu.memory_space<vmem>>, vector<16x32xf32>
    tpu.vector_store %arg15[%c0_56, %c0_57], %108 {strides = array<i32>} : memref<16x32xf32, #tpu.memory_space<vmem>>, vector<16x32xf32>,
    return
  }
  func.func @transform_0(%arg0: i32) -> (i32, i32) {
    %c0_i32 = arith.constant 0 : i32
    %c0_i32_0 = arith.constant 0 : i32
    return %arg0, %c0_i32 : i32, i32
  }
  func.func @transform_1(%arg0: i32) -> (i32, i32, i32) {
    %c0_i32 = arith.constant 0 : i32
    %c0_i32_0 = arith.constant 0 : i32
    %c0_i32_1 = arith.constant 0 : i32
    %c0_i32_2 = arith.constant 0 : i32
    return %c0_i32, %c0_i32_0, %c0_i32_1 : i32, i32, i32
  }
  func.func @transform_2(%arg0: i32) -> (i32, i32, i32) {
    %c0_i32 = arith.constant 0 : i32
    %c0_i32_0 = arith.constant 0 : i32
    %c0_i32_1 = arith.constant 0 : i32
    %c0_i32_2 = arith.constant 0 : i32
    return %c0_i32, %c0_i32_0, %c0_i32_1 : i32, i32, i32
  }
  func.func @transform_3(%arg0: i32) -> (i32, i32, i32) {
    %c0_i32 = arith.constant 0 : i32
    %c0_i32_0 = arith.constant 0 : i32
    %c0_i32_1 = arith.constant 0 : i32
    %c0_i32_2 = arith.constant 0 : i32
    return %c0_i32, %c0_i32_0, %c0_i32_1 : i32, i32, i32
  }
  func.func @transform_4(%arg0: i32) -> (i32, i32, i32) {
    %c0_i32 = arith.constant 0 : i32
    %c0_i32_0 = arith.constant 0 : i32
    %c0_i32_1 = arith.constant 0 : i32
    %c0_i32_2 = arith.constant 0 : i32
    return %c0_i32, %c0_i32_0, %c0_i32_1 : i32, i32, i32
  }
  func.func @transform_5(%arg0: i32) -> (i32, i32) {
    %c0_i32 = arith.constant 0 : i32
    %c0_i32_0 = arith.constant 0 : i32
    %c0_i32_1 = arith.constant 0 : i32
    return %c0_i32, %c0_i32_0 : i32, i32
  }
  func.func @transform_6(%arg0: i32) -> (i32, i32) {
    %c0_i32 = arith.constant 0 : i32
    %c0_i32_0 = arith.constant 0 : i32
    %c0_i32_1 = arith.constant 0 : i32
    return %c0_i32, %c0_i32_0 : i32, i32
  }
  func.func @transform_7(%arg0: i32) -> (i32, i32) {
    %c0_i32 = arith.constant 0 : i32
    %c0_i32_0 = arith.constant 0 : i32
    %c0_i32_1 = arith.constant 0 : i32
    return %c0_i32, %c0_i32_0 : i32, i32
  }
  func.func @transform_8(%arg0: i32) -> (i32, i32) {
    %c0_i32 = arith.constant 0 : i32
    %c0_i32_0 = arith.constant 0 : i32
    %c0_i32_1 = arith.constant 0 : i32
    return %c0_i32, %c0_i32_0 : i32, i32
  }
  func.func @transform_9(%arg0: i32) -> (i32, i32) {
    %c0_i32 = arith.constant 0 : i32
    %c0_i32_0 = arith.constant 0 : i32
    %c0_i32_1 = arith.constant 0 : i32
    return %c0_i32, %c0_i32_0 : i32, i32
  }
  func.func @transform_10(%arg0: i32) -> (i32, i32) {
    %c0_i32 = arith.constant 0 : i32
    %c0_i32_0 = arith.constant 0 : i32
    %c0_i32_1 = arith.constant 0 : i32
    return %c0_i32, %c0_i32_0 : i32, i32
  }
  func.func @transform_11(%arg0: i32) -> (i32, i32) {
    %c0_i32 = arith.constant 0 : i32
    %c0_i32_0 = arith.constant 0 : i32
    %c0_i32_1 = arith.constant 0 : i32
    return %c0_i32, %c0_i32_0 : i32, i32
  }
  func.func @transform_12(%arg0: i32) -> (i32, i32) {
    %c0_i32 = arith.constant 0 : i32
    %c0_i32_0 = arith.constant 0 : i32
    %c0_i32_1 = arith.constant 0 : i32
    return %c0_i32, %c0_i32_0 : i32, i32
  }
  func.func @transform_13(%arg0: i32) -> (i32, i32) {
    %c0_i32 = arith.constant 0 : i32
    %c0_i32_0 = arith.constant 0 : i32
    %c0_i32_1 = arith.constant 0 : i32
    return %c0_i32, %c0_i32_0 : i32, i32
  }
  func.func @transform_14(%arg0: i32) -> (i32, i32) {
    %c0_i32 = arith.constant 0 : i32
    %c0_i32_0 = arith.constant 0 : i32
    return %arg0, %c0_i32 : i32, i32
  }
}

</mosaic_0001>

<bundles_post_ra>
// kernel: tpu_custom_call.1
= control target key start
LH: loop header
LB: loop body
LE: loop exit
PB: predicated region body
PF: predicated region fallthrough
CT: control target
= control target key end

     0   :  { %s2512_s0 = inlined_call_operand.vmem [shape: f32[32,32], index: 0, kind: input, shape index: {}]   ;;  %s2513_s1 = inlined_call_operand.vmem [shape: f32[4,32,8], index: 1, kind: input, shape index: {}]   ;;  %s2514_s2 = inlined_call_operand.vmem [shape: f32[4,32,8], index: 2, kind: input, shape index: {}]   ;;  %s2515_s3 = inlined_call_operand.vmem [shape: f32[4,32,8], index: 3, kind: input, shape index: {}]   ;;  %s2516_s4 = inlined_call_operand.vmem [shape: f32[4,8,32], index: 4, kind: input, shape index: {}]   ;;  %s2517_s5 = inlined_call_operand.vmem [shape: f32[1,32], index: 5, kind: input, shape index: {}]   ;;  %s2518_s6 = inlined_call_operand.vmem [shape: f32[1,32], index: 6, kind: input, shape index: {}]   ;;  %s2519_s7 = inlined_call_operand.vmem [shape: f32[1,32], index: 7, kind: input, shape index: {}]   ;;  %s2520_s8 = inlined_call_operand.vmem [shape: f32[1,32], index: 8, kind: input, shape index: {}]   ;;  %s2521_s9 = inlined_call_operand.vmem [shape: f32[1,32], index: 9, kind: input, shape index: {}]   ;;  %s2522_s10 = inlined_call_operand.vmem [shape: f32[32,128], index: 10, kind: input, shape index: {}]   ;;  %s2523_s11 = inlined_call_operand.vmem [shape: f32[1,128], index: 11, kind: input, shape index: {}]   ;;  %s2524_s12 = inlined_call_operand.vmem [shape: f32[128,32], index: 12, kind: input, shape index: {}]   ;;  %s2525_s13 = inlined_call_operand.vmem [shape: f32[1,32], index: 13, kind: input, shape index: {}]   ;;  %s2526_s14 = inlined_call_operand.hbm [shape: f32[32,32], index: 14, kind: output, shape index: {}]  }
   0x1   :  { %2528 = sst [smem:[#allocation7_spill]] %s2512_s0 }
   0x2   :  { %2529 = sst [smem:[#allocation8_spill]] %s2513_s1 }
   0x3   :  { %19 = vsyncpa [#allocation3], 0 }
   0x4   :  { %21 = vsyncpa [#allocation3 + $0x1], 0  ;;  %s2016_s29 = smov 0   ;;  %s2018_s30 = smov 0  }
   0x5   :  { %s2020_s15 = smov 0   ;;  %s2022_s16 = smov 0  }
   0x6 LB: > { %2530 = sst [smem:[#allocation5_spill]] %s1932_s15  ;;  %s2037_s17 = sadd.s32 4294967295, %s1936_s16   ;;  %s1936_s16 = sphi %s2022_s16, %s2541_s16   ;;  %s1932_s15 = sphi %s2020_s15, %s2540_s15   ;;  %s1928_s30 = sphi %s2018_s30, %s2539_s30   ;;  %s1924_s29 = sphi %s2016_s29, %s2538_s29  }
   0x7   : > { %s1708_s18 = sadd.s32 4294967294, %s1936_s16   ;;  %s2041_s19 = sadd.s32 1, %s1936_s16  }
   0x8   : > { %s333_s20 = sadd.s32 1, %s1932_s15  ;;  %s330_s21 = ssub.s32 %s1936_s16, %s2041_s19 }
   0x9   : > { %p343_p0 = scmp.ne.s32.totalorder %s1932_s15, %s1928_s30  ;;  %p331_p1 = scmp.eq.s32.totalorder %s330_s21, 0 }
   0xa   : > { %p344_p2 = scmp.eq.s32.totalorder %s2037_s17, 1  ;;  %p349_p3 = scmp.ne.s32.totalorder %s1928_s30, %s1924_s29 }
   0xb   : > { %p350_p4 = scmp.eq.s32.totalorder %s1708_s18, 1  ;;  %p1711_p7 = scmp.ge.s32.totalorder %s1936_s16, 1 }
   0xc   : > { %s2052_s22 = scalar_select %p331_p1, %s1932_s15, %s333_s20  }
   0xd   : > { %p2054_p5 = por %p344_p2, %p343_p0  ;;  %p2058_p6 = por %p350_p4, %p349_p3 }
   0xe   : > { %2531 = sst [smem:[#allocation6_spill]] %s2052_s22  ;;  %p416_p8 = scmp.lt.s32.totalorder %s1936_s16, 3 }
  0x10   : > { %p417_p9 = pnand %p1711_p7, %p416_p8 }
  0x11   : > { %s1713_s25 = sshll.u32 (!%p417_p9), %s2037_s17, 1  ;;  %s2534_s0 = sld [smem:[#allocation7_spill]] (!%p417_p9) }
  0x12   : > { %420 = sbr.rel (%p417_p9) target bundleno = 2053 (0x805), region = 76  ;;  %p463_p10 = scmp.lt.s32.totalorder (!%p417_p9), %s1713_s25, 3 }
  0x13   : > { %s2535_s1 = sld [smem:[#allocation8_spill]] (!%p417_p9)  ;;  %s1778_s21 = sshll.u32 (!%p417_p9), %s2037_s17, 4 }
  0x14   : > { %s1642_s27 = scalar_lea.hbm (!%p417_p9), %s2526_s14, %s1778_s21 }
  0x17   : > { %s2543_s25 = smov (!%p463_p10, %s1713_s25), 3  ;;  %vm473_vm0 = vcmask 261120   ;;  %v1938_v4 = vmov 32.0   ;;  %v656_v23 = vld [vmem:[%s2514_s2 + $0x38] sm:$0xff]  ;;  %v655_v26 = vld [vmem:[%s2514_s2 + $0x30] sm:$0xff]  ;;  %v654_v29 = vld [vmem:[%s2514_s2 + $0x28] sm:$0xff] }
  0x18   : > { %s1714_s26 = sshll.u32 %s2543_s25, 3  ;;  %1832 = vrcp.f32 %v1938_v4  ;;  %700 = vmatpush.msra.mxu1 %v656_v23  ;;  %v653_v32 = vld [vmem:[%s2514_s2 + $0x20] sm:$0xff]  ;;  %v652_v33 = vld [vmem:[%s2514_s2 + $0x18] sm:$0xff]  ;;  %v651_v35 = vld [vmem:[%s2514_s2 + $0x10] sm:$0xff]  ;;  %vm865_vm8 = vcmask 64512   ;;  %s1894_s25 = scalar_lea.hbm %s2526_s14, 32 }
  0x19   : > { %s466_s18 = scalar_lea.vmem %s2534_s0, %s1714_s26  ;;  %v538_v21 = vld [vmem:[%s2535_s1 + $0x18] sm:$0xff]  ;;  %v537_v24 = vld [vmem:[%s2535_s1 + $0x10] sm:$0xff]  ;;  %v536_v27 = vld [vmem:[%s2535_s1 + $0x8] sm:$0xff]  ;;  %s459_s0 = sand.u32 1, %s1928_s30  }
  0x1a   : > { %v2068_v0 = vld [vmem:[%s466_s18] sm:$0xff]  ;;  %v2072_v2 = vld [vmem:[%s466_s18 + $0x8] sm:$0xff]  ;;  %v542_v22 = vld [vmem:[%s2535_s1 + $0x38] sm:$0xff]  ;;  %569 = vmatpush.msra.mxu0 %v538_v21  ;;  %1779 = vmatpush.msra.mxu3 %v538_v21  ;;  %s1712_s22 = sshll.u32 %s459_s0, 4  ;;  %s1631_s18 = scalar_lea.sflag [#allocation3], %s459_s0 }
  0x1b   : > { %v474_v1 = vsel %vm473_vm0, %v2068_v0, 0.0  ;;  %v477_v3 = vsel %vm473_vm0, %v2072_v2, 0.0  ;;  %592 = vmatpush.msra.mxu2 %v542_v22  ;;  %v541_v25 = vld [vmem:[%s2535_s1 + $0x30] sm:$0xff]  ;;  %701 = vmatpush.msra.mxu1 %v655_v26  ;;  %v540_v28 = vld [vmem:[%s2535_s1 + $0x28] sm:$0xff]  ;;  %v535_v30 = vld [vmem:[%s2535_s1] sm:$0xff]  ;;  %s461_s20 = scalar_lea.vmem [#allocation2], %s1712_s22 }
  0x1c   : > { %475 = vadd.xlane.f32.xlu0 %v474_v1  ;;  %570 = vmatpush.msra.mxu0 %v537_v24  ;;  %v539_v31 = vld [vmem:[%s2535_s1 + $0x20] sm:$0xff]  ;;  %v650_v37 = vld [vmem:[%s2514_s2 + $0x8] sm:$0xff]  ;;  %v546_v40 = vld [vmem:[%s2535_s1 + $0x58] sm:$0xff]  ;;  %s1643_s28 = sshll.u32 %s461_s20, 4  ;;  %s1644_s28 = int_to_ptr.vmem [resolvable:$true] %s1643_s28 }
  0x1d   : > { %593 = vmatpush.msra.mxu2 %v541_v25  ;;  %1780 = vmatpush.msra.mxu3 %v537_v24  ;;  %v649_v39 = vld [vmem:[%s2514_s2] sm:$0xff]  ;;  %v550_v41 = vld [vmem:[%s2535_s1 + $0x78] sm:$0xff]  ;;  %v545_v43 = vld [vmem:[%s2535_s1 + $0x50] sm:$0xff] }
  0x1e   : > { %v1833_v5 = vpop.eup %1832  ;;  %571 = vmatpush.msra.mxu0 %v536_v27  ;;  %702 = vmatpush.msra.mxu1 %v654_v29  ;;  %v764_v42 = vld [vmem:[%s2515_s3 + $0x38] sm:$0xff]  ;;  %v549_v44 = vld [vmem:[%s2535_s1 + $0x70] sm:$0xff]  ;;  %v544_v47 = vld [vmem:[%s2535_s1 + $0x48] sm:$0xff] }
  0x1f   : > { %v481_v6 = vmul.f32 32.0, %v1833_v5  ;;  %vm485_vm1 = vweird.f32 %v1833_v5  ;;  %594 = vmatpush.msra.mxu2 %v540_v28  ;;  %1781 = vmatpush.msra.mxu3 %v536_v27  ;;  %v763_v45 = vld [vmem:[%s2515_s3 + $0x30] sm:$0xff]  ;;  %v548_v48 = vld [vmem:[%s2535_s1 + $0x68] sm:$0xff]  ;;  %v543_v51 = vld [vmem:[%s2535_s1 + $0x40] sm:$0xff] }
  0x20   : > { %572 = vmatpush.msra.mxu0 %v535_v30  ;;  %703 = vmatpush.msra.mxu1 %v653_v32  ;;  %v762_v50 = vld [vmem:[%s2515_s3 + $0x28] sm:$0xff]  ;;  %v547_v52 = vld [vmem:[%s2535_s1 + $0x60] sm:$0xff]  ;;  %v663_v25 = vld [vmem:[%s2514_s2 + $0x70] sm:$0xff]  ;;  %s1645_s1 = sshll.u32 %s1642_s27, 4  ;;  %s1646_s1 = int_to_ptr.hbm [resolvable:$true] %s1645_s1 }
  0x21   : > { %v482_v7 = vsub.f32 1.0, %v481_v6  ;;  %595 = vmatpush.msra.mxu2 %v539_v31  ;;  %1782 = vmatpush.msra.mxu3 %v535_v30  ;;  %v761_v55 = vld [vmem:[%s2515_s3 + $0x20] sm:$0xff]  ;;  %v662_v26 = vld [vmem:[%s2514_s2 + $0x68] sm:$0xff]  ;;  %v768_v28 = vld [vmem:[%s2515_s3 + $0x58] sm:$0xff]  ;;  %s1888_s15 = sshra.s32 %s1646_s1, 4  ;;  %s1889_s15 = int_to_ptr.hbm [resolvable:$true] %s1888_s15 }
  0x22   : > { %677 = vmatpush.msrb.mxu0 %v652_v33  ;;  %808 = vmatpush.msrb.mxu1 %v764_v42  ;;  %v1825_v63 = vld [vmem:[%s2518_s6] ss:$0 sm:$0xff]  ;;  %v772_v29 = vld [vmem:[%s2515_s3 + $0x78] sm:$0xff]  ;;  %v767_v30 = vld [vmem:[%s2515_s3 + $0x50] sm:$0xff]  ;;  %s1890_s22 = scalar_lea.hbm %s1889_s15, 16  ;;  %p1895_p0 = scmp.lt.s32.totalorder %s1889_s15, %s2526_s14 }
  0x23   : > { %v483_v8 = vmul.f32 %v1833_v5, %v482_v7  ;;  %615 = vmatpush.msrb.mxu2 %v546_v40  ;;  %638 = vmatpush.msrb.mxu3 %v550_v41  ;;  %v1826_v4 = vld [vmem:[%s2519_s7] ss:$0 sm:$0xff]  ;;  %v771_v31 = vld [vmem:[%s2515_s3 + $0x70] sm:$0xff]  ;;  %v766_v32 = vld [vmem:[%s2515_s3 + $0x48] sm:$0xff]  ;;  %p1891_p11 = scmp.ne.s32.totalorder %s1889_s15, %s1890_s22  ;;  %p1896_p1 = scmp.lt.s32.totalorder %s1894_s25, %s1890_s22 }
  0x24   : > { %478 = vadd.xlane.f32.xlu0 %v477_v3  ;;  %678 = vmatpush.msrb.mxu0 %v651_v35  ;;  %v757_v22 = vld [vmem:[%s2515_s3] sm:$0xff]  ;;  %v770_v33 = vld [vmem:[%s2515_s3 + $0x68] sm:$0xff] }
  0x25   : > { %v484_v9 = vadd.f32 %v1833_v5, %v483_v8  ;;  %616 = vmatpush.msrb.mxu2 %v545_v43  ;;  %639 = vmatpush.msrb.mxu3 %v549_v44  ;;  %v657_v24 = vld [vmem:[%s2514_s2 + $0x40] sm:$0xff]  ;;  %p1892_p12 = pnand %p1891_p11, %p2054_p5  ;;  %p1897_p2 = por %p1896_p1, %p1895_p0 }
  0x26   : > { %679 = vmatpush.msrb.mxu0 %v650_v37  ;;  %809 = vmatpush.msrb.mxu1 %v763_v45  ;;  %v661_v27 = vld [vmem:[%s2514_s2 + $0x60] sm:$0xff] }
  0x27   : > { %v2076_v10 = vsel %vm485_vm1, %v1833_v5, %v484_v9  ;;  %617 = vmatpush.msrb.mxu2 %v544_v47  ;;  %640 = vmatpush.msrb.mxu3 %v548_v48  ;;  %v769_v35 = vld [vmem:[%s2515_s3 + $0x60] sm:$0xff]  ;;  %p1893_p13 = pneg %p1892_p12 }
  0x28   : > { %680 = vmatpush.msrb.mxu0 %v649_v39  ;;  %810 = vmatpush.msrb.mxu1 %v762_v50 }
  0x29   : > { %618 = vmatpush.msrb.mxu2 %v543_v51  ;;  %641 = vmatpush.msrb.mxu3 %v547_v52  ;;  %p1898_p3 = pnand %p1897_p2, %p1893_p13 }
  0x2a   : > { %811 = vmatpush.msrb.mxu1 %v761_v55 }
  0x8f   : > { %v476_v11 = vpop.xlane.xlu0 %475 }
  0x90   : > { %v487_v12 = vmul.f32 %v2076_v10, %v476_v11  ;;  %v760_v11 = vld [vmem:[%s2515_s3 + $0x18] sm:$0xff] }
  0x92   : > { %v2080_v13 = vsub.f32 %v2068_v0, %v487_v12 }
  0x94   : > { %v491_v14 = vmul.f32 %v2080_v13, %v2080_v13 }
  0x96   : > { %v493_v15 = vsel %vm473_vm0, %v491_v14, 0.0  ;;  %v660_v14 = vld [vmem:[%s2514_s2 + $0x58] sm:$0xff] }
  0x97   : > { %494 = vadd.xlane.f32.xlu1 %v493_v15  ;;  %v479_v16 = vpop.xlane.xlu0 %478 }
  0x98   : > { %v488_v17 = vmul.f32 %v2076_v10, %v479_v16  ;;  %v659_v16 = vld [vmem:[%s2514_s2 + $0x50] sm:$0xff] }
  0x9a   : > { %v2087_v18 = vsub.f32 %v2072_v2, %v488_v17 }
  0x9c   : > { %v492_v19 = vmul.f32 %v2087_v18, %v2087_v18 }
  0x9e   : > { %v496_v20 = vsel %vm473_vm0, %v492_v19, 0.0  ;;  %v758_v19 = vld [vmem:[%s2515_s3 + $0x8] sm:$0xff] }
  0x9f   : > { %497 = vadd.xlane.f32.xlu1 %v496_v20  ;;  %v658_v20 = vld [vmem:[%s2514_s2 + $0x48] sm:$0xff] }
 0x10a   : > { %v495_v34 = vpop.xlane.xlu1 %494 }
 0x10b   : > { %v499_v36 = vmul.f32 %v495_v34, %v2076_v10  ;;  %v765_v34 = vld [vmem:[%s2515_s3 + $0x40] sm:$0xff] }
 0x10d   : > { %v501_v38 = vadd.f32 1e-05, %v499_v36 }
 0x10f   : > { %1834 = vrsqrt.f32 %v501_v38  ;;  %vm509_vm3 = vweird.f32 %v501_v38 }
 0x112   : > { %v498_v46 = vpop.xlane.xlu1 %497 }
 0x113   : > { %v500_v49 = vmul.f32 %v498_v46, %v2076_v10 }
 0x115   : > { %v1835_v53 = vpop.eup %1834  ;;  %v502_v54 = vadd.f32 1e-05, %v500_v49 }
 0x116   : > { %v504_v56 = vmul.f32 %v1835_v53, %v501_v38  ;;  %vm510_vm2 = vweird.f32 %v1835_v53 }
 0x117   : > { %1836 = vrsqrt.f32 %v502_v54  ;;  %vm511_vm4 = vmor %vm509_vm3, %vm510_vm2  ;;  %vm519_vm6 = vweird.f32 %v502_v54 }
 0x118   : > { %v505_v57 = vmul.f32 %v1835_v53, %v504_v56 }
 0x11a   : > { %v506_v58 = vmul.f32 0.5, %v505_v57 }
 0x11c   : > { %v507_v59 = vsub.f32 1.5, %v506_v58 }
 0x11d   : > { %v1837_v60 = vpop.eup %1836 }
 0x11e   : > { %v508_v61 = vmul.f32 %v1835_v53, %v507_v59  ;;  %v514_v62 = vmul.f32 %v1837_v60, %v502_v54  ;;  %vm520_vm5 = vweird.f32 %v1837_v60 }
 0x11f   : > { %vm521_vm7 = vmor %vm519_vm6, %vm520_vm5 }
 0x120   : > { %v512_v1 = vsel %vm511_vm4, %v1835_v53, %v508_v61  ;;  %v515_v3 = vmul.f32 %v1837_v60, %v514_v62 }
 0x121   : > { %v523_v5 = vmul.f32 %v512_v1, %v2080_v13  ;;  %v759_v13 = vld [vmem:[%s2515_s3 + $0x10] sm:$0xff] }
 0x122   : > { %v516_v6 = vmul.f32 0.5, %v515_v3 }
 0x123   : > { %v528_v7 = vmul.f32 %v1825_v63, %v523_v5 }
 0x124   : > { %v517_v8 = vsub.f32 1.5, %v516_v6 }
 0x125   : > { %v2185_v9 = vadd.f32 %v1826_v4, %v528_v7 }
 0x126   : > { %v518_v12 = vmul.f32 %v1837_v60, %v517_v8 }
 0x127   : > { %1715 = vmatmul.msk.f32.vlgmr.msra.gmra.mxu0 %vm473_vm0, %v2185_v9  ;;  %1717 = vmatmul.msk.f32.vlgmr.msra.gmra.mxu2 %vm473_vm0, %v2185_v9 }
 0x128   : > { %v522_v15 = vsel %vm521_vm7, %v1837_v60, %v518_v12  ;;  %1725 = vmatmul.msk.f32.vlgmr.msra.gmra.mxu1 %vm473_vm0, %v2185_v9  ;;  %785 = vmatpush.msra.mxu0 %v760_v11 }
 0x129   : > { %v524_v17 = vmul.f32 %v522_v15, %v2087_v18  ;;  %723 = vmatpush.msra.mxu2 %v660_v14  ;;  %v664_v18 = vld [vmem:[%s2514_s2 + $0x78] sm:$0xff] }
 0x12a   : > { %786 = vmatpush.msra.mxu0 %v759_v13 }
 0x12b   : > { %v529_v21 = vmul.f32 %v1825_v63, %v524_v17  ;;  %724 = vmatpush.msra.mxu2 %v659_v16 }
 0x12c   : > { %787 = vmatpush.msra.mxu0 %v758_v19 }
 0x12d   : > { %v534_v23 = vadd.f32 %v1826_v4, %v529_v21  ;;  %725 = vmatpush.msra.mxu2 %v658_v20 }
 0x12e   : > { %788 = vmatpush.msra.mxu0 %v757_v22 }
 0x12f   : > { %1716 = vmatmul.msk.f32.vlgmr.msra.gmra.mxu3 %vm473_vm0, %v534_v23  ;;  %1718 = vmatmul.msk.f32.gmra.mxu2 %vm473_vm0, %v534_v23 }
 0x130   : > { %1723 = vmatmul.msk.f32.vlgmr.msrb.gmra.mxu0 %vm473_vm0, %v2185_v9  ;;  %1726 = vmatmul.msk.f32.gmra.mxu1 %vm473_vm0, %v534_v23 }
 0x131   : > { %746 = vmatpush.msra.mxu3 %v664_v18  ;;  %726 = vmatpush.msra.mxu2 %v657_v24 }
 0x133   : > { %747 = vmatpush.msra.mxu3 %v663_v25 }
 0x135   : > { %748 = vmatpush.msra.mxu3 %v662_v26 }
 0x137   : > { %1719 = vmatmul.msk.f32.vlgmr.msrb.gmra.mxu2 %vm473_vm0, %v2185_v9  ;;  %1721 = vmatmul.msk.f32.vlgmr.msrb.gmra.mxu3 %vm473_vm0, %v2185_v9 }
 0x138   : > { %1724 = vmatmul.msk.f32.gmra.mxu0 %vm473_vm0, %v534_v23  ;;  %1733 = vmatmul.msk.f32.vlgmr.msrb.gmra.mxu1 %vm473_vm0, %v2185_v9 }
 0x139   : > { %749 = vmatpush.msra.mxu3 %v661_v27  ;;  %831 = vmatpush.msrb.mxu2 %v768_v28 }
 0x13b   : > { %854 = vmatpush.msrb.mxu3 %v772_v29  ;;  %832 = vmatpush.msrb.mxu2 %v767_v30 }
 0x13d   : > { %855 = vmatpush.msrb.mxu3 %v771_v31  ;;  %833 = vmatpush.msrb.mxu2 %v766_v32 }
 0x13f   : > { %856 = vmatpush.msrb.mxu3 %v770_v33  ;;  %1720 = vmatmul.msk.f32.gmra.mxu2 %vm473_vm0, %v534_v23 }
 0x140   : > { %1722 = vmatmul.msk.f32.gmra.mxu3 %vm473_vm0, %v534_v23  ;;  %1731 = vmatmul.msk.f32.vlgmr.msra.gmra.mxu0 %vm473_vm0, %v2185_v9 }
 0x141   : > { %1734 = vmatmul.msk.f32.gmra.mxu1 %vm473_vm0, %v534_v23  ;;  %834 = vmatpush.msrb.mxu2 %v765_v34 }
 0x142   : > { %857 = vmatpush.msrb.mxu3 %v769_v35 }
 0x147   : > { %1727 = vmatmul.msk.f32.vlgmr.msra.gmra.mxu2 %vm473_vm0, %v2185_v9 }
 0x148   : > { %1729 = vmatmul.msk.f32.vlgmr.msra.gmra.mxu3 %vm473_vm0, %v2185_v9  ;;  %1732 = vmatmul.msk.f32.gmra.mxu0 %vm473_vm0, %v534_v23 }
 0x14f   : > { %1728 = vmatmul.msk.f32.gmra.mxu2 %vm473_vm0, %v534_v23 }
 0x150   : > { %1730 = vmatmul.msk.f32.gmra.mxu3 %vm473_vm0, %v534_v23 }
 0x157   : > { %1735 = vmatmul.msk.f32.vlgmr.msrb.gmra.mxu2 %vm473_vm0, %v2185_v9 }
 0x158   : > { %1737 = vmatmul.msk.f32.vlgmr.msrb.gmra.mxu3 %vm473_vm0, %v2185_v9 }
 0x15f   : > { %1736 = vmatmul.msk.f32.gmra.mxu2 %vm473_vm0, %v534_v23 }
 0x160   : > { %1738 = vmatmul.msk.f32.gmra.mxu3 %vm473_vm0, %v534_v23 }
 0x1a4   : > { %v574_v36 = vpop.f32.mrf.mxu0 }
 0x1a5   : > { %v705_v37 = vpop.f32.mrf.mxu1 }
 0x1a6   : > { %1741 = vmatpush.xpose.msk.msra.mxu1 %vm865_vm8, %v705_v37 }
 0x1aa   : > { %v597_v38 = vpop.f32.mrf.mxu2 }
 0x1ab   : > { %1742 = vmatmul.msk.f32.vlgmr.msra.gmra.mxu1 %vm865_vm8, %v597_v38 }
 0x1ad   : > { %v682_v39 = vpop.f32.mrf.mxu0  ;;  %v708_v40 = vpop.f32.mrf.mxu1 }
 0x1ae   : > { %1739 = vmatpush.xpose.msk.msrb.mxu0 %vm865_vm8, %v682_v39 }
 0x1b1   : > { %1740 = vmatmul.msk.f32.vlgmr.msrb.gmra.mxu0 %vm865_vm8, %v574_v36 }
 0x1b2   : > { %v2288_v41 = vpop.f32.mrf.mxu3  ;;  %v2290_v42 = vpop.f32.mrf.mxu2 }
 0x1b5   : > { %v685_v43 = vpop.f32.mrf.mxu0  ;;  %v813_v44 = vpop.f32.mrf.mxu1 }
 0x1b6   : > { %1055 = vmatpush.msrb.mxu1 %v813_v44 }
 0x1b8   : > { %1753 = vmatpush.xpose.msk.msra.mxu1 %vm865_vm8, %v708_v40 }
 0x1ba   : > { %v620_v45 = vpop.f32.mrf.mxu2  ;;  %v643_v46 = vpop.f32.mrf.mxu3 }
 0x1bd   : > { %v790_v47 = vpop.f32.mrf.mxu0 }
 0x1be   : > { %1032 = vmatpush.msra.mxu0 %v790_v47  ;;  %v2304_v56 = vpop.f32.mrf.mxu1 }
 0x1c0   : > { %1751 = vmatpush.xpose.msk.msrb.mxu0 %vm865_vm8, %v685_v43 }
 0x1c2   : > { %v2294_v48 = vpop.f32.mrf.mxu2 }
 0x1c3   : > { %v2296_v49 = vpop.f32.mrf.mxu3 }
 0x1c5   : > { %v793_v57 = vpop.f32.mrf.mxu0 }
 0x1ca   : > { %v728_v50 = vpop.f32.mrf.mxu2 }
 0x1cb   : > { %v751_v51 = vpop.f32.mrf.mxu3  ;;  %1743 = vmatpush.xpose.msk.msra.mxu2 %vm865_vm8, %v728_v50 }
 0x1cc   : > { %1745 = vmatpush.xpose.msk.msra.mxu3 %vm865_vm8, %v751_v51 }
 0x1ce   : > { %1744 = vmatmul.msk.f32.vlgmr.msra.gmra.mxu2 %vm865_vm8, %v620_v45 }
 0x1cf   : > { %1746 = vmatmul.msk.f32.vlgmr.msra.gmra.mxu3 %vm865_vm8, %v643_v46 }
 0x1d2   : > { %v731_v52 = vpop.f32.mrf.mxu2 }
 0x1d3   : > { %v754_v53 = vpop.f32.mrf.mxu3 }
 0x1da   : > { %v836_v54 = vpop.f32.mrf.mxu2 }
 0x1db   : > { %v859_v55 = vpop.f32.mrf.mxu3  ;;  %1078 = vmatpush.msrb.mxu2 %v836_v54 }
 0x1dc   : > { %1101 = vmatpush.msrb.mxu3 %v859_v55 }
 0x1dd   : > { %1755 = vmatpush.xpose.msk.msra.mxu2 %vm865_vm8, %v731_v52 }
 0x1de   : > { %1757 = vmatpush.xpose.msk.msra.mxu3 %vm865_vm8, %v754_v53 }
 0x1e2   : > { %v839_v62 = vpop.f32.mrf.mxu2 }
 0x1e3   : > { %v862_v63 = vpop.f32.mrf.mxu3 }
 0x228   : > { %v915_v58 = vpop.f32.mrf.mxu1 }
 0x229   : > { %v973_v59 = vsel %vm865_vm8, %v915_v58, -inf }
 0x22a   : > { %974 = vmax.xlane.f32.xlu1 %v973_v59 }
 0x22e   : > { %v889_v60 = vpop.f32.mrf.mxu0 }
 0x22f   : > { %v970_v61 = vsel %vm865_vm8, %v889_v60, -inf }
 0x230   : > { %971 = vmax.xlane.f32.xlu0 %v970_v61 }
 0x251   : > { %v941_v1 = vpop.f32.mrf.mxu2 }
 0x252   : > { %v976_v3 = vsel %vm865_vm8, %v941_v1, -inf  ;;  %v967_v4 = vpop.f32.mrf.mxu3 }
 0x253   : > { %977 = vmax.xlane.f32.xlu2 %v976_v3  ;;  %v979_v5 = vsel %vm865_vm8, %v967_v4, -inf }
 0x25b   : > { %980 = vmax.xlane.f32.xlu2 %v979_v5 }
 0x29d   : > { %v975_v12 = vpop.xlane.xlu1 %974 }
 0x29e   : > { %v983_v15 = vsub.f32 %v915_v58, %v975_v12 }
 0x2a0   : > { %v988_v17 = vmul.f32 1.442695, %v983_v15  ;;  %v1347_v15 = vld [vmem:[%s2516_s4 + $0x8] sm:$0xff] }
 0x2a3   : > { %v972_v6 = vpop.xlane.xlu0 %971 }
 0x2a4   : > { %v982_v7 = vsub.f32 %v889_v60, %v972_v6 }
 0x2a6   : > { %v986_v8 = vmul.f32 1.442695, %v982_v7 }
 0x2a8   : > { %1838 = vpow2.f32 %v986_v8 }
 0x2ae   : > { %v1839_v9 = vpop.eup %1838 }
 0x2af   : > { %v994_v11 = vsel %vm865_vm8, %v1839_v9, 0.0 }
 0x2b0   : > { %995 = vadd.xlane.f32.xlu1 %v994_v11 }
 0x2c6   : > { %v978_v14 = vpop.xlane.xlu2 %977 }
 0x2c7   : > { %v984_v13 = vsub.f32 %v941_v1, %v978_v14 }
 0x2c9   : > { %v990_v16 = vmul.f32 1.442695, %v984_v13  ;;  %v1348_v13 = vld [vmem:[%s2516_s4 + $0x10] sm:$0xff] }
 0x2cb   : > { %1840 = vpow2.f32 %v990_v16  ;;  %v1349_v16 = vld [vmem:[%s2516_s4 + $0x18] sm:$0xff] }
 0x2cc   : > { %1842 = vpow2.f32 %v988_v17 }
 0x2ce   : > { %v981_v19 = vpop.xlane.xlu2 %980 }
 0x2cf   : > { %v985_v20 = vsub.f32 %v967_v4, %v981_v19 }
 0x2d1   : > { %v1841_v21 = vpop.eup %1840  ;;  %v992_v22 = vmul.f32 1.442695, %v985_v20 }
 0x2d2   : > { %v1000_v23 = vsel %vm865_vm8, %v1841_v21, 0.0  ;;  %v1843_v18 = vpop.eup %1842 }
 0x2d3   : > { %1844 = vpow2.f32 %v992_v22  ;;  %1001 = vadd.xlane.f32.xlu2 %v1000_v23  ;;  %v997_v25 = vsel %vm865_vm8, %v1843_v18, 0.0 }
 0x2d9   : > { %v1845_v24 = vpop.eup %1844 }
 0x2da   : > { %v1003_v26 = vsel %vm865_vm8, %v1845_v24, 0.0 }
 0x2db   : > { %998 = vadd.xlane.f32.xlu2 %v997_v25  ;;  %1004 = vadd.xlane.f32.xlu0 %v1003_v26 }
 0x323   : > { %v996_v27 = vpop.xlane.xlu1 %995 }
 0x324   : > { %1846 = vrcp.f32 %v996_v27 }
 0x32a   : > { %v1847_v28 = vpop.eup %1846 }
 0x32b   : > { %v1010_v29 = vmul.f32 %v1847_v28, %v1839_v9  ;;  %v1346_v9 = vld [vmem:[%s2516_s4] sm:$0xff] }
 0x32d   : > { %1747 = vmatmul.msk.f32.vlgmr.msra.gmra.mxu0 %vm865_vm8, %v1010_v29 }
 0x32e   : > { %1272 = vmatpush.msra.mxu0 %v793_v57 }
 0x335   : > { %1752 = vmatmul.msk.f32.vlgmr.msrb.gmra.mxu0 %vm865_vm8, %v2288_v41 }
 0x336   : > { %1371 = vmatpush.msrb.mxu0 %v1346_v9 }
 0x346   : > { %v1002_v30 = vpop.xlane.xlu2 %1001 }
 0x347   : > { %1848 = vrcp.f32 %v1002_v30 }
 0x34d   : > { %v1849_v31 = vpop.eup %1848 }
 0x34e   : > { %v1012_v32 = vmul.f32 %v1849_v31, %v1841_v21  ;;  %v1005_v33 = vpop.xlane.xlu0 %1004  ;;  %v999_v34 = vpop.xlane.xlu2 %998 }
 0x34f   : > { %1850 = vrcp.f32 %v1005_v33 }
 0x350   : > { %1852 = vrcp.f32 %v999_v34  ;;  %1749 = vmatmul.msk.f32.vlgmr.msrb.gmra.mxu2 %vm865_vm8, %v1012_v32 }
 0x351   : > { %1318 = vmatpush.msrb.mxu2 %v839_v62 }
 0x355   : > { %v1851_v35 = vpop.eup %1850 }
 0x356   : > { %v1853_v36 = vpop.eup %1852  ;;  %v1013_v37 = vmul.f32 %v1851_v35, %v1845_v24 }
 0x357   : > { %v1011_v38 = vmul.f32 %v1853_v36, %v1843_v18 }
 0x358   : > { %1750 = vmatmul.msk.f32.vlgmr.msrb.gmra.mxu3 %vm865_vm8, %v1013_v37  ;;  %1756 = vmatmul.msk.f32.vlgmr.msra.gmra.mxu2 %vm865_vm8, %v2294_v48 }
 0x359   : > { %1748 = vmatmul.msk.f32.vlgmr.msrb.gmra.mxu1 %vm865_vm8, %v1011_v38  ;;  %1341 = vmatpush.msrb.mxu3 %v862_v63 }
 0x35a   : > { %1295 = vmatpush.msrb.mxu1 %v2304_v56  ;;  %1429 = vmatpush.msra.mxu2 %v1348_v13 }
 0x360   : > { %1758 = vmatmul.msk.f32.vlgmr.msra.gmra.mxu3 %vm865_vm8, %v2296_v49 }
 0x361   : > { %1754 = vmatmul.msk.f32.vlgmr.msra.gmra.mxu1 %vm865_vm8, %v2290_v42  ;;  %1458 = vmatpush.msra.mxu3 %v1349_v16 }
 0x362   : > { %1400 = vmatpush.msra.mxu1 %v1347_v15 }
 0x3aa   : > { %v1034_v39 = vpop.f32.mrf.mxu0 }
 0x3b2   : > { %v1129_v40 = vpop.f32.mrf.mxu0 }
 0x3b3   : > { %v1210_v41 = vsel %vm865_vm8, %v1129_v40, -inf }
 0x3b4   : > { %1211 = vmax.xlane.f32.xlu2 %v1210_v41 }
 0x3d3   : > { %v2328_v43 = vpop.f32.mrf.mxu2 }
 0x3d6   : > { %v2330_v44 = vpop.f32.mrf.mxu1 }
 0x3db   : > { %v2332_v45 = vpop.f32.mrf.mxu3  ;;  %v1181_v46 = vpop.f32.mrf.mxu2 }
 0x3dc   : > { %v1216_v47 = vsel %vm865_vm8, %v1181_v46, -inf }
 0x3dd   : > { %1217 = vmax.xlane.f32.xlu0 %v1216_v47 }
 0x3de   : > { %v1155_v48 = vpop.f32.mrf.mxu1 }
 0x3df   : > { %v1213_v42 = vsel %vm865_vm8, %v1155_v48, -inf }
 0x3e3   : > { %v1207_v49 = vpop.f32.mrf.mxu3 }
 0x3e4   : > { %v1219_v50 = vsel %vm865_vm8, %v1207_v49, -inf }
 0x3e5   : > { %1220 = vmax.xlane.f32.xlu1 %v1219_v50  ;;  %1214 = vmax.xlane.f32.xlu0 %v1213_v42 }
 0x427   : > { %v1212_v51 = vpop.xlane.xlu2 %1211 }
 0x428   : > { %v1222_v52 = vsub.f32 %v1129_v40, %v1212_v51 }
 0x42a   : > { %v1226_v53 = vmul.f32 1.442695, %v1222_v52 }
 0x42c   : > { %1854 = vpow2.f32 %v1226_v53 }
 0x432   : > { %v1855_v54 = vpop.eup %1854 }
 0x433   : > { %v1234_v55 = vsel %vm865_vm8, %v1855_v54, 0.0 }
 0x434   : > { %1235 = vadd.xlane.f32.xlu0 %v1234_v55 }
 0x450   : > { %v1218_v56 = vpop.xlane.xlu0 %1217 }
 0x451   : > { %v1224_v57 = vsub.f32 %v1181_v46, %v1218_v56 }
 0x453   : > { %v1230_v58 = vmul.f32 1.442695, %v1224_v57 }
 0x455   : > { %1856 = vpow2.f32 %v1230_v58 }
 0x458   : > { %v1221_v59 = vpop.xlane.xlu1 %1220  ;;  %v1215_v60 = vpop.xlane.xlu0 %1214 }
 0x459   : > { %v1225_v61 = vsub.f32 %v1207_v49, %v1221_v59  ;;  %v1223_v62 = vsub.f32 %v1155_v48, %v1215_v60 }
 0x45b   : > { %v1857_v63 = vpop.eup %1856  ;;  %v1232_v1 = vmul.f32 1.442695, %v1225_v61  ;;  %v1228_v3 = vmul.f32 1.442695, %v1223_v62 }
 0x45c   : > { %v1240_v4 = vsel %vm865_vm8, %v1857_v63, 0.0 }
 0x45d   : > { %1858 = vpow2.f32 %v1232_v1  ;;  %1241 = vadd.xlane.f32.xlu1 %v1240_v4  ;;  %v1546_v1 = vld [vmem:[%s2522_s10 + $0x10] sm:$0xff] }
 0x45e   : > { %1860 = vpow2.f32 %v1228_v3  ;;  %v1544_v3 = vld [vmem:[%s2522_s10] sm:$0xff] }
 0x463   : > { %v1859_v5 = vpop.eup %1858 }
 0x464   : > { %v1861_v6 = vpop.eup %1860  ;;  %v1243_v7 = vsel %vm865_vm8, %v1859_v5, 0.0 }
 0x465   : > { %1244 = vadd.xlane.f32.xlu2 %v1243_v7  ;;  %v1237_v8 = vsel %vm865_vm8, %v1861_v6, 0.0 }
 0x466   : > { %1238 = vadd.xlane.f32.xlu1 %v1237_v8 }
 0x4a7   : > { %v1236_v11 = vpop.xlane.xlu0 %1235 }
 0x4a8   : > { %1862 = vrcp.f32 %v1236_v11 }
 0x4ae   : > { %v1863_v12 = vpop.eup %1862 }
 0x4af   : > { %v1250_v14 = vmul.f32 %v1863_v12, %v1855_v54 }
 0x4b1   : > { %1759 = vmatmul.msk.f32.vlgmr.msra.gmra.mxu0 %vm865_vm8, %v1250_v14 }
 0x4b9   : > { %1763 = vmatmul.msk.f32.vlgmr.msrb.gmra.mxu0 %vm865_vm8, %v1034_v39  ;;  %v1827_v39 = vld [vmem:[%s2517_s5] ss:$0 sm:$0xff] }
 0x4d0   : > { %v1242_v17 = vpop.xlane.xlu1 %1241 }
 0x4d1   : > { %1864 = vrcp.f32 %v1242_v17 }
 0x4d7   : > { %v1865_v19 = vpop.eup %1864 }
 0x4d8   : > { %v1252_v20 = vmul.f32 %v1865_v19, %v1857_v63  ;;  %v1245_v21 = vpop.xlane.xlu2 %1244  ;;  %v1547_v63 = vld [vmem:[%s2522_s10 + $0x18] sm:$0xff] }
 0x4d9   : > { %v1239_v22 = vpop.xlane.xlu1 %1238  ;;  %1866 = vrcp.f32 %v1245_v21  ;;  %1570 = vmatpush.msra.mxu0 %v1547_v63 }
 0x4da   : > { %1868 = vrcp.f32 %v1239_v22  ;;  %1761 = vmatmul.msk.f32.vlgmr.msrb.gmra.mxu2 %vm865_vm8, %v1252_v20  ;;  %v1828_v20 = vld [vmem:[%s2520_s8] ss:$0 sm:$0xff] }
 0x4db   : > { %1571 = vmatpush.msra.mxu0 %v1546_v1 }
 0x4df   : > { %v1867_v23 = vpop.eup %1866 }
 0x4e0   : > { %v1869_v18 = vpop.eup %1868  ;;  %v1253_v24 = vmul.f32 %v1867_v23, %v1859_v5  ;;  %v1829_v23 = vld [vmem:[%s2521_s9] ss:$0 sm:$0xff] }
 0x4e1   : > { %v1251_v25 = vmul.f32 %v1869_v18, %v1861_v6 }
 0x4e2   : > { %1762 = vmatmul.msk.f32.vlgmr.msrb.gmra.mxu3 %vm865_vm8, %v1253_v24  ;;  %1767 = vmatmul.msk.f32.vlgmr.msra.gmra.mxu2 %vm865_vm8, %v2328_v43 }
 0x4e3   : > { %1760 = vmatmul.msk.f32.vlgmr.msrb.gmra.mxu1 %vm865_vm8, %v1251_v25  ;;  %v1598_v25 = vld [vmem:[%s2524_s12 + $0x78] sm:$0xff] }
 0x4e4   : > { %1603 = vmatpush.msrb.mxu1 %v1598_v25 }
 0x4ea   : > { %1769 = vmatmul.msk.f32.vlgmr.msra.gmra.mxu3 %vm865_vm8, %v2332_v45 }
 0x4eb   : > { %1765 = vmatmul.msk.f32.vlgmr.msra.gmra.mxu1 %vm865_vm8, %v2330_v44 }
 0x52e   : > { %v1274_v26 = vpop.f32.mrf.mxu0 }
 0x52f   : > { %1764 = vmatmul.msk.f32.gmra.mxu0 %vm865_vm8, %v1274_v26  ;;  %v1597_v26 = vld [vmem:[%s2524_s12 + $0x70] sm:$0xff] }
 0x530   : > { %1604 = vmatpush.msrb.mxu1 %v1597_v26 }
 0x536   : > { %v1373_v30 = vpop.f32.mrf.mxu0 }
 0x537   : > { %v1466_v32 = vsel %vm473_vm0, %v1373_v30, 0.0  ;;  %v1593_v30 = vld [vmem:[%s2524_s12 + $0x50] sm:$0xff] }
 0x55d   : > { %v1320_v27 = vpop.f32.mrf.mxu2 }
 0x55e   : > { %1768 = vmatmul.msk.f32.gmra.mxu2 %vm865_vm8, %v1320_v27  ;;  %v1596_v27 = vld [vmem:[%s2524_s12 + $0x68] sm:$0xff] }
 0x55f   : > { %1605 = vmatpush.msrb.mxu1 %v1596_v27 }
 0x560   : > { %v1297_v28 = vpop.f32.mrf.mxu1 }
 0x561   : > { %1766 = vmatmul.msk.f32.gmra.mxu1 %vm865_vm8, %v1297_v28  ;;  %v1595_v28 = vld [vmem:[%s2524_s12 + $0x60] sm:$0xff] }
 0x562   : > { %1606 = vmatpush.msrb.mxu1 %v1595_v28 }
 0x565   : > { %v1343_v29 = vpop.f32.mrf.mxu3  ;;  %v1431_v33 = vpop.f32.mrf.mxu2 }
 0x566   : > { %1770 = vmatmul.msk.f32.gmra.mxu3 %vm865_vm8, %v1343_v29  ;;  %v1469_v36 = vsel %vm473_vm0, %v1431_v33, 0.0  ;;  %v1594_v29 = vld [vmem:[%s2524_s12 + $0x58] sm:$0xff] }
 0x567   : > { %1607 = vmatpush.msrb.mxu1 %v1594_v29  ;;  %v1590_v33 = vld [vmem:[%s2524_s12 + $0x38] sm:$0xff] }
 0x568   : > { %v1402_v31 = vpop.f32.mrf.mxu1 }
 0x569   : > { %v1467_v34 = vsel %vm473_vm0, %v1402_v31, 0.0  ;;  %1608 = vmatpush.msrb.mxu1 %v1593_v30  ;;  %v1592_v31 = vld [vmem:[%s2524_s12 + $0x48] sm:$0xff] }
 0x56a   : > { %v1468_v35 = vadd.f32 %v1467_v34, %v1466_v32  ;;  %v1591_v32 = vld [vmem:[%s2524_s12 + $0x40] sm:$0xff]  ;;  %v1589_v34 = vld [vmem:[%s2524_s12 + $0x30] sm:$0xff] }
 0x56b   : > { %1609 = vmatpush.msrb.mxu1 %v1592_v31 }
 0x56c   : > { %v1470_v38 = vadd.f32 %v1469_v36, %v1468_v35  ;;  %v1588_v35 = vld [vmem:[%s2524_s12 + $0x28] sm:$0xff]  ;;  %v1587_v36 = vld [vmem:[%s2524_s12 + $0x20] sm:$0xff] }
 0x56d   : > { %v1460_v37 = vpop.f32.mrf.mxu3  ;;  %1610 = vmatpush.msrb.mxu1 %v1591_v32 }
 0x56e   : > { %v1471_v40 = vsel %vm473_vm0, %v1460_v37, 0.0  ;;  %v1586_v37 = vld [vmem:[%s2524_s12 + $0x18] sm:$0xff] }
 0x56f   : > { %v1472_v41 = vadd.f32 %v1471_v40, %v1470_v38  ;;  %1611 = vmatpush.msrb.mxu1 %v1590_v33  ;;  %v1585_v38 = vld [vmem:[%s2524_s12 + $0x10] sm:$0xff] }
 0x571   : > { %v1484_v43 = vadd.f32 %v1827_v39, %v1472_v41  ;;  %1612 = vmatpush.msrb.mxu1 %v1589_v34  ;;  %v1584_v41 = vld [vmem:[%s2524_s12 + $0x8] sm:$0xff] }
 0x573   : > { %v2376_v44 = vadd.f32 %v1484_v43, %v2068_v0  ;;  %1613 = vmatpush.msrb.mxu1 %v1588_v35  ;;  %v1583_v43 = vld [vmem:[%s2524_s12] sm:$0xff] }
 0x575   : > { %v1490_v45 = vsel %vm473_vm0, %v2376_v44, 0.0  ;;  %1614 = vmatpush.msrb.mxu1 %v1587_v36 }
 0x576   : > { %1491 = vadd.xlane.f32.xlu2 %v1490_v45 }
 0x577   : > { %1615 = vmatpush.msrb.mxu1 %v1586_v37 }
 0x579   : > { %1616 = vmatpush.msrb.mxu1 %v1585_v38 }
 0x57b   : > { %1617 = vmatpush.msrb.mxu1 %v1584_v41 }
 0x57d   : > { %1618 = vmatpush.msrb.mxu1 %v1583_v43 }
 0x5ac   : > { %v1376_v47 = vpop.f32.mrf.mxu0 }
 0x5ad   : > { %v1473_v50 = vsel %vm473_vm0, %v1376_v47, 0.0 }
 0x5de   : > { %v1405_v46 = vpop.f32.mrf.mxu1 }
 0x5df   : > { %v1474_v49 = vsel %vm473_vm0, %v1405_v46, 0.0 }
 0x5e0   : > { %v1475_v51 = vadd.f32 %v1474_v49, %v1473_v50 }
 0x5e1   : > { %v1434_v48 = vpop.f32.mrf.mxu2 }
 0x5e2   : > { %v1476_v42 = vsel %vm473_vm0, %v1434_v48, 0.0 }
 0x5e3   : > { %v1477_v52 = vadd.f32 %v1476_v42, %v1475_v51 }
 0x5e9   : > { %v1492_v53 = vpop.xlane.xlu2 %1491  ;;  %v1463_v54 = vpop.f32.mrf.mxu3 }
 0x5ea   : > { %v1496_v0 = vmul.f32 %v1492_v53, %v2076_v10  ;;  %v1478_v55 = vsel %vm473_vm0, %v1463_v54, 0.0  ;;  %v1830_v54 = vld [vmem:[%s2523_s11] ss:$0 sm:$0xff] }
 0x5eb   : > { %v1479_v56 = vadd.f32 %v1478_v55, %v1477_v52 }
 0x5ec   : > { %v1498_v57 = vsub.f32 %v2376_v44, %v1496_v0 }
 0x5ed   : > { %v1485_v58 = vadd.f32 %v1827_v39, %v1479_v56 }
 0x5ee   : > { %v1500_v59 = vmul.f32 %v1498_v57, %v1498_v57 }
 0x5ef   : > { %v2387_v60 = vadd.f32 %v1485_v58, %v2072_v2  ;;  %v1545_v2 = vld [vmem:[%s2522_s10 + $0x8] sm:$0xff] }
 0x5f0   : > { %v1502_v61 = vsel %vm473_vm0, %v1500_v59, 0.0  ;;  %1572 = vmatpush.msra.mxu0 %v1545_v2 }
 0x5f1   : > { %1503 = vadd.xlane.f32.xlu1 %v1502_v61  ;;  %v1493_v62 = vsel %vm473_vm0, %v2387_v60, 0.0  ;;  %v1831_v61 = vld [vmem:[%s2525_s13] ss:$0 sm:$0xff] }
 0x5f2   : > { %1494 = vadd.xlane.f32.xlu0 %v1493_v62  ;;  %1573 = vmatpush.msra.mxu0 %v1544_v3 }
 0x664   : > { %v1504_v4 = vpop.xlane.xlu1 %1503 }
 0x665   : > { %v1508_v5 = vmul.f32 %v1504_v4, %v2076_v10  ;;  %v1495_v6 = vpop.xlane.xlu0 %1494 }
 0x666   : > { %v1497_v7 = vmul.f32 %v1495_v6, %v2076_v10 }
 0x667   : > { %v1510_v8 = vadd.f32 1e-05, %v1508_v5 }
 0x668   : > { %v2407_v9 = vsub.f32 %v2387_v60, %v1497_v7 }
 0x669   : > { %1870 = vrsqrt.f32 %v1510_v8  ;;  %vm1518_vm10 = vweird.f32 %v1510_v8 }
 0x66a   : > { %v1501_v11 = vmul.f32 %v2407_v9, %v2407_v9 }
 0x66c   : > { %v1505_v12 = vsel %vm473_vm0, %v1501_v11, 0.0 }
 0x66d   : > { %1506 = vadd.xlane.f32.xlu2 %v1505_v12 }
 0x66f   : > { %v1871_v14 = vpop.eup %1870 }
 0x670   : > { %v1513_v13 = vmul.f32 %v1871_v14, %v1510_v8  ;;  %vm1519_vm9 = vweird.f32 %v1871_v14 }
 0x671   : > { %vm1520_vm11 = vmor %vm1518_vm10, %vm1519_vm9 }
 0x672   : > { %v1514_v15 = vmul.f32 %v1871_v14, %v1513_v13 }
 0x674   : > { %v1515_v16 = vmul.f32 0.5, %v1514_v15 }
 0x676   : > { %v1516_v17 = vsub.f32 1.5, %v1515_v16 }
 0x678   : > { %v1517_v19 = vmul.f32 %v1871_v14, %v1516_v17 }
 0x67a   : > { %v1521_v21 = vsel %vm1520_vm11, %v1871_v14, %v1517_v19 }
 0x67b   : > { %v1532_v22 = vmul.f32 %v1521_v21, %v1498_v57 }
 0x67d   : > { %v1537_v18 = vmul.f32 %v1828_v20, %v1532_v22 }
 0x67f   : > { %v1542_v24 = vadd.f32 %v1829_v23, %v1537_v18 }
 0x681   : > { %1771 = vmatmul.msk.f32.vlgmr.msra.gmra.mxu0 %vm473_vm0, %v1542_v24 }
 0x6e0   : > { %v1507_v39 = vpop.xlane.xlu2 %1506 }
 0x6e1   : > { %v1509_v40 = vmul.f32 %v1507_v39, %v2076_v10 }
 0x6e3   : > { %v1511_v45 = vadd.f32 1e-05, %v1509_v40 }
 0x6e5   : > { %1872 = vrsqrt.f32 %v1511_v45  ;;  %vm1528_vm13 = vweird.f32 %v1511_v45 }
 0x6eb   : > { %v1873_v46 = vpop.eup %1872 }
 0x6ec   : > { %v1523_v47 = vmul.f32 %v1873_v46, %v1511_v45  ;;  %vm1529_vm12 = vweird.f32 %v1873_v46 }
 0x6ed   : > { %vm1530_vm14 = vmor %vm1528_vm13, %vm1529_vm12 }
 0x6ee   : > { %v1524_v48 = vmul.f32 %v1873_v46, %v1523_v47 }
 0x6f0   : > { %v1525_v49 = vmul.f32 0.5, %v1524_v48 }
 0x6f2   : > { %v1526_v50 = vsub.f32 1.5, %v1525_v49 }
 0x6f4   : > { %v1527_v10 = vmul.f32 %v1873_v46, %v1526_v50 }
 0x6f6   : > { %v1531_v42 = vsel %vm1530_vm14, %v1873_v46, %v1527_v10 }
 0x6f7   : > { %v1533_v51 = vmul.f32 %v1531_v42, %v2407_v9 }
 0x6f9   : > { %v1538_v52 = vmul.f32 %v1828_v20, %v1533_v51 }
 0x6fb   : > { %v1543_v53 = vadd.f32 %v1829_v23, %v1538_v52 }
 0x6fd   : > { %1772 = vmatmul.msk.f32.gmra.mxu0 %vm473_vm0, %v1543_v53 }
 0x6fe   : > { %v1575_v0 = vpop.f32.mrf.mxu0 }
 0x6ff   : > { %v1576_v55 = vadd.f32 %v1830_v54, %v1575_v0 }
 0x701   : > { %v1581_v56 = vmax.f32 %v1576_v55, 0.0 }
 0x703   : > { %1619 = vmatmul.f32.vlgmr.msrb.gmra.mxu1 %v1581_v56 }
 0x77a   : > { %v1578_v57 = vpop.f32.mrf.mxu0 }
 0x77b   : > { %v1579_v58 = vadd.f32 %v1830_v54, %v1578_v57 }
 0x77d   : > { %v1582_v59 = vmax.f32 %v1579_v58, 0.0 }
 0x77f   : > { %1622 = vmatmul.f32.gmra.mxu1 %v1582_v59 }
 0x780   : > { %v1620_v62 = vpop.f32.mrf.mxu1 }
 0x781   : > { %v1621_v63 = vadd.f32 %v1831_v61, %v1620_v62 }
 0x783   : > { %v1626_v1 = vadd.f32 %v1621_v63, %v2376_v44 }
 0x785   : > { %1628 = vst.msk [vmem:[%s461_s20] sm:$0xff] %vm473_vm0, %v1626_v1 }
 0x7fc   : > { %v1623_v2 = vpop.f32.mrf.mxu1 }
 0x7fd   : > { %v1624_v3 = vadd.f32 %v1831_v61, %v1623_v2 }
 0x7ff   : > { %v1627_v4 = vadd.f32 %v1624_v3, %v2387_v60 }
 0x801   : > { %1629 = vst.msk [vmem:[%s461_s20 + $0x8] sm:$0xff] %vm473_vm0, %v1627_v4 }
 0x802   : > { %1901 = shalt.err (!%p1898_p3)
}
 0x803   : > { %s1939_s0 = smov 128   ;;  %s1940_s20 = smov 8  }
 0x804   : > { %1783 = dma.vmem_to_hbm [thread:$0]  (%p2054_p5), %s1644_s28, 256, %s1646_s1, %s1631_s18, %s1939_s0, %s1939_s0, %s1940_s20  }
 0x805 PF: > { %p1789_p4 = scmp.ge.s32.totalorder %s1936_s16, 2  ;;  %s1660_s17 = sand.u32 1, %s1924_s29  }
 0x806   : > { %s1661_s21 = scalar_lea.sflag [#allocation3], %s1660_s17 }
 0x807   : > { %p1786_p7 = pnand %p1789_p4, %p2058_p6 }
 0x809   : > { %p1787_p8 = pneg %p1786_p7 }
 0x80b   : > { %1919 = dma.done.wait (%p1787_p8), %s1661_s21, 256  }
 0x80c   : > { %1921 = vsyncadd (%p1787_p8), %s1661_s21, 4294967040  ;;  %s2536_s15 = sld [smem:[#allocation5_spill]]  ;;  %p24_p9 = scmp.ge.s32.totalorder %s2041_s19, 4  }
 0x80d   : > { %s2537_s22 = sld [smem:[#allocation6_spill]]  ;;  %s2538_s29 = smov %s1928_s30 }
 0x80e   : > { %s2541_s16 = smov %s2041_s19 }
 0x80f   :  { %26 = sbr.rel (!%p24_p9) target bundleno = 6 (0x6), region = 111 }
 0x812   : > { %s2539_s30 = smov %s2536_s15 }
 0x813   : > { %s2540_s15 = smov %s2537_s22 }
 0x814   :  { %1667 = vsyncpa [#allocation3], 1 }
 0x815   :  { %1669 = vsyncpa [#allocation3 + $0x1], 1 }

// kernel: tpu_custom_call.1
= control target key start
LH: loop header
LB: loop body
LE: loop exit
PB: predicated region body
PF: predicated region fallthrough
CT: control target
= control target key end

     0   :  { %s2512_s0 = inlined_call_operand.vmem [shape: f32[32,32], index: 0, kind: input, shape index: {}]   ;;  %s2513_s1 = inlined_call_operand.vmem [shape: f32[4,32,8], index: 1, kind: input, shape index: {}]   ;;  %s2514_s2 = inlined_call_operand.vmem [shape: f32[4,32,8], index: 2, kind: input, shape index: {}]   ;;  %s2515_s3 = inlined_call_operand.vmem [shape: f32[4,32,8], index: 3, kind: input, shape index: {}]   ;;  %s2516_s4 = inlined_call_operand.vmem [shape: f32[4,8,32], index: 4, kind: input, shape index: {}]   ;;  %s2517_s5 = inlined_call_operand.vmem [shape: f32[1,32], index: 5, kind: input, shape index: {}]   ;;  %s2518_s6 = inlined_call_operand.vmem [shape: f32[1,32], index: 6, kind: input, shape index: {}]   ;;  %s2519_s7 = inlined_call_operand.vmem [shape: f32[1,32], index: 7, kind: input, shape index: {}]   ;;  %s2520_s8 = inlined_call_operand.vmem [shape: f32[1,32], index: 8, kind: input, shape index: {}]   ;;  %s2521_s9 = inlined_call_operand.vmem [shape: f32[1,32], index: 9, kind: input, shape index: {}]   ;;  %s2522_s10 = inlined_call_operand.vmem [shape: f32[32,128], index: 10, kind: input, shape index: {}]   ;;  %s2523_s11 = inlined_call_operand.vmem [shape: f32[1,128], index: 11, kind: input, shape index: {}]   ;;  %s2524_s12 = inlined_call_operand.vmem [shape: f32[128,32], index: 12, kind: input, shape index: {}]   ;;  %s2525_s13 = inlined_call_operand.vmem [shape: f32[1,32], index: 13, kind: input, shape index: {}]   ;;  %s2526_s14 = inlined_call_operand.hbm [shape: f32[32,32], index: 14, kind: output, shape index: {}]  }
   0x1   :  { %2528 = sst [smem:[#allocation7_spill]] %s2512_s0 }
   0x2   :  { %2529 = sst [smem:[#allocation8_spill]] %s2513_s1 }
   0x3   :  { %19 = vsyncpa [#allocation3], 0 }
   0x4   :  { %21 = vsyncpa [#allocation3 + $0x1], 0  ;;  %s2016_s29 = smov 0   ;;  %s2018_s30 = smov 0  }
   0x5   :  { %s2020_s15 = smov 0   ;;  %s2022_s16 = smov 0  }
   0x6 LB: > { %2530 = sst [smem:[#allocation5_spill]] %s1932_s15  ;;  %s2037_s17 = sadd.s32 4294967295, %s1936_s16   ;;  %s1936_s16 = sphi %s2022_s16, %s2541_s16   ;;  %s1932_s15 = sphi %s2020_s15, %s2540_s15   ;;  %s1928_s30 = sphi %s2018_s30, %s2539_s30   ;;  %s1924_s29 = sphi %s2016_s29, %s2538_s29  }
   0x7   : > { %s1708_s18 = sadd.s32 4294967294, %s1936_s16   ;;  %s2041_s19 = sadd.s32 1, %s1936_s16  }
   0x8   : > { %s333_s20 = sadd.s32 1, %s1932_s15  ;;  %s330_s21 = ssub.s32 %s1936_s16, %s2041_s19 }
   0x9   : > { %p343_p0 = scmp.ne.s32.totalorder %s1932_s15, %s1928_s30  ;;  %p331_p1 = scmp.eq.s32.totalorder %s330_s21, 0 }
   0xa   : > { %p344_p2 = scmp.eq.s32.totalorder %s2037_s17, 1  ;;  %p349_p3 = scmp.ne.s32.totalorder %s1928_s30, %s1924_s29 }
   0xb   : > { %p350_p4 = scmp.eq.s32.totalorder %s1708_s18, 1  ;;  %p1711_p7 = scmp.ge.s32.totalorder %s1936_s16, 1 }
   0xc   : > { %s2052_s22 = scalar_select %p331_p1, %s1932_s15, %s333_s20  }
   0xd   : > { %p2054_p5 = por %p344_p2, %p343_p0  ;;  %p2058_p6 = por %p350_p4, %p349_p3 }
   0xe   : > { %2531 = sst [smem:[#allocation6_spill]] %s2052_s22  ;;  %p416_p8 = scmp.lt.s32.totalorder %s1936_s16, 3 }
  0x10   : > { %p417_p9 = pnand %p1711_p7, %p416_p8 }
  0x11   : > { %s1713_s25 = sshll.u32 (!%p417_p9), %s2037_s17, 1  ;;  %s2534_s0 = sld [smem:[#allocation7_spill]] (!%p417_p9) }
  0x12   : > { %420 = sbr.rel (%p417_p9) target bundleno = 2053 (0x805), region = 76  ;;  %p463_p10 = scmp.lt.s32.totalorder (!%p417_p9), %s1713_s25, 3 }
  0x13   : > { %s2535_s1 = sld [smem:[#allocation8_spill]] (!%p417_p9)  ;;  %s1778_s21 = sshll.u32 (!%p417_p9), %s2037_s17, 4 }
  0x14   : > { %s1642_s27 = scalar_lea.hbm (!%p417_p9), %s2526_s14, %s1778_s21 }
  0x17   : > { %s2543_s25 = smov (!%p463_p10, %s1713_s25), 3  ;;  %vm473_vm0 = vcmask 261120   ;;  %v1938_v4 = vmov 32.0   ;;  %v656_v23 = vld [vmem:[%s2514_s2 + $0x38] sm:$0xff]  ;;  %v655_v26 = vld [vmem:[%s2514_s2 + $0x30] sm:$0xff]  ;;  %v654_v29 = vld [vmem:[%s2514_s2 + $0x28] sm:$0xff] }
  0x18   : > { %s1714_s26 = sshll.u32 %s2543_s25, 3  ;;  %1832 = vrcp.f32 %v1938_v4  ;;  %700 = vmatpush.msra.mxu1 %v656_v23  ;;  %v653_v32 = vld [vmem:[%s2514_s2 + $0x20] sm:$0xff]  ;;  %v652_v33 = vld [vmem:[%s2514_s2 + $0x18] sm:$0xff]  ;;  %v651_v35 = vld [vmem:[%s2514_s2 + $0x10] sm:$0xff]  ;;  %vm865_vm8 = vcmask 64512   ;;  %s1894_s25 = scalar_lea.hbm %s2526_s14, 32 }
  0x19   : > { %s466_s18 = scalar_lea.vmem %s2534_s0, %s1714_s26  ;;  %v538_v21 = vld [vmem:[%s2535_s1 + $0x18] sm:$0xff]  ;;  %v537_v24 = vld [vmem:[%s2535_s1 + $0x10] sm:$0xff]  ;;  %v536_v27 = vld [vmem:[%s2535_s1 + $0x8] sm:$0xff]  ;;  %s459_s0 = sand.u32 1, %s1928_s30  }
  0x1a   : > { %v2068_v0 = vld [vmem:[%s466_s18] sm:$0xff]  ;;  %v2072_v2 = vld [vmem:[%s466_s18 + $0x8] sm:$0xff]  ;;  %v542_v22 = vld [vmem:[%s2535_s1 + $0x38] sm:$0xff]  ;;  %569 = vmatpush.msra.mxu0 %v538_v21  ;;  %1779 = vmatpush.msra.mxu3 %v538_v21  ;;  %s1712_s22 = sshll.u32 %s459_s0, 4  ;;  %s1631_s18 = scalar_lea.sflag [#allocation3], %s459_s0 }
  0x1b   : > { %v474_v1 = vsel %vm473_vm0, %v2068_v0, 0.0  ;;  %v477_v3 = vsel %vm473_vm0, %v2072_v2, 0.0  ;;  %592 = vmatpush.msra.mxu2 %v542_v22  ;;  %v541_v25 = vld [vmem:[%s2535_s1 + $0x30] sm:$0xff]  ;;  %701 = vmatpush.msra.mxu1 %v655_v26  ;;  %v540_v28 = vld [vmem:[%s2535_s1 + $0x28] sm:$0xff]  ;;  %v535_v30 = vld [vmem:[%s2535_s1] sm:$0xff]  ;;  %s461_s20 = scalar_lea.vmem [#allocation2], %s1712_s22 }
  0x1c   : > { %475 = vadd.xlane.f32.xlu0 %v474_v1  ;;  %570 = vmatpush.msra.mxu0 %v537_v24  ;;  %v539_v31 = vld [vmem:[%s2535_s1 + $0x20] sm:$0xff]  ;;  %v650_v37 = vld [vmem:[%s2514_s2 + $0x8] sm:$0xff]  ;;  %v546_v40 = vld [vmem:[%s2535_s1 + $0x58] sm:$0xff]  ;;  %s1643_s28 = sshll.u32 %s461_s20, 4  ;;  %s1644_s28 = int_to_ptr.vmem [resolvable:$true] %s1643_s28 }
  0x1d   : > { %593 = vmatpush.msra.mxu2 %v541_v25  ;;  %1780 = vmatpush.msra.mxu3 %v537_v24  ;;  %v649_v39 = vld [vmem:[%s2514_s2] sm:$0xff]  ;;  %v550_v41 = vld [vmem:[%s2535_s1 + $0x78] sm:$0xff]  ;;  %v545_v43 = vld [vmem:[%s2535_s1 + $0x50] sm:$0xff] }
  0x1e   : > { %v1833_v5 = vpop.eup %1832  ;;  %571 = vmatpush.msra.mxu0 %v536_v27  ;;  %702 = vmatpush.msra.mxu1 %v654_v29  ;;  %v764_v42 = vld [vmem:[%s2515_s3 + $0x38] sm:$0xff]  ;;  %v549_v44 = vld [vmem:[%s2535_s1 + $0x70] sm:$0xff]  ;;  %v544_v47 = vld [vmem:[%s2535_s1 + $0x48] sm:$0xff] }
  0x1f   : > { %v481_v6 = vmul.f32 32.0, %v1833_v5  ;;  %vm485_vm1 = vweird.f32 %v1833_v5  ;;  %594 = vmatpush.msra.mxu2 %v540_v28  ;;  %1781 = vmatpush.msra.mxu3 %v536_v27  ;;  %v763_v45 = vld [vmem:[%s2515_s3 + $0x30] sm:$0xff]  ;;  %v548_v48 = vld [vmem:[%s2535_s1 + $0x68] sm:$0xff]  ;;  %v543_v51 = vld [vmem:[%s2535_s1 + $0x40] sm:$0xff] }
  0x20   : > { %572 = vmatpush.msra.mxu0 %v535_v30  ;;  %703 = vmatpush.msra.mxu1 %v653_v32  ;;  %v762_v50 = vld [vmem:[%s2515_s3 + $0x28] sm:$0xff]  ;;  %v547_v52 = vld [vmem:[%s2535_s1 + $0x60] sm:$0xff]  ;;  %v663_v25 = vld [vmem:[%s2514_s2 + $0x70] sm:$0xff]  ;;  %s1645_s1 = sshll.u32 %s1642_s27, 4  ;;  %s1646_s1 = int_to_ptr.hbm [resolvable:$true] %s1645_s1 }
  0x21   : > { %v482_v7 = vsub.f32 1.0, %v481_v6  ;;  %595 = vmatpush.msra.mxu2 %v539_v31  ;;  %1782 = vmatpush.msra.mxu3 %v535_v30  ;;  %v761_v55 = vld [vmem:[%s2515_s3 + $0x20] sm:$0xff]  ;;  %v662_v26 = vld [vmem:[%s2514_s2 + $0x68] sm:$0xff]  ;;  %v768_v28 = vld [vmem:[%s2515_s3 + $0x58] sm:$0xff]  ;;  %s1888_s15 = sshra.s32 %s1646_s1, 4  ;;  %s1889_s15 = int_to_ptr.hbm [resolvable:$true] %s1888_s15 }
  0x22   : > { %677 = vmatpush.msrb.mxu0 %v652_v33  ;;  %808 = vmatpush.msrb.mxu1 %v764_v42  ;;  %v1825_v63 = vld [vmem:[%s2518_s6] ss:$0 sm:$0xff]  ;;  %v772_v29 = vld [vmem:[%s2515_s3 + $0x78] sm:$0xff]  ;;  %v767_v30 = vld [vmem:[%s2515_s3 + $0x50] sm:$0xff]  ;;  %s1890_s22 = scalar_lea.hbm %s1889_s15, 16  ;;  %p1895_p0 = scmp.lt.s32.totalorder %s1889_s15, %s2526_s14 }
  0x23   : > { %v483_v8 = vmul.f32 %v1833_v5, %v482_v7  ;;  %615 = vmatpush.msrb.mxu2 %v546_v40  ;;  %638 = vmatpush.msrb.mxu3 %v550_v41  ;;  %v1826_v4 = vld [vmem:[%s2519_s7] ss:$0 sm:$0xff]  ;;  %v771_v31 = vld [vmem:[%s2515_s3 + $0x70] sm:$0xff]  ;;  %v766_v32 = vld [vmem:[%s2515_s3 + $0x48] sm:$0xff]  ;;  %p1891_p11 = scmp.ne.s32.totalorder %s1889_s15, %s1890_s22  ;;  %p1896_p1 = scmp.lt.s32.totalorder %s1894_s25, %s1890_s22 }
  0x24   : > { %478 = vadd.xlane.f32.xlu0 %v477_v3  ;;  %678 = vmatpush.msrb.mxu0 %v651_v35  ;;  %v757_v22 = vld [vmem:[%s2515_s3] sm:$0xff]  ;;  %v770_v33 = vld [vmem:[%s2515_s3 + $0x68] sm:$0xff] }
  0x25   : > { %v484_v9 = vadd.f32 %v1833_v5, %v483_v8  ;;  %616 = vmatpush.msrb.mxu2 %v545_v43  ;;  %639 = vmatpush.msrb.mxu3 %v549_v44  ;;  %v657_v24 = vld [vmem:[%s2514_s2 + $0x40] sm:$0xff]  ;;  %p1892_p12 = pnand %p1891_p11, %p2054_p5  ;;  %p1897_p2 = por %p1896_p1, %p1895_p0 }
  0x26   : > { %679 = vmatpush.msrb.mxu0 %v650_v37  ;;  %809 = vmatpush.msrb.mxu1 %v763_v45  ;;  %v661_v27 = vld [vmem:[%s2514_s2 + $0x60] sm:$0xff] }
  0x27   : > { %v2076_v10 = vsel %vm485_vm1, %v1833_v5, %v484_v9  ;;  %617 = vmatpush.msrb.mxu2 %v544_v47  ;;  %640 = vmatpush.msrb.mxu3 %v548_v48  ;;  %v769_v35 = vld [vmem:[%s2515_s3 + $0x60] sm:$0xff]  ;;  %p1893_p13 = pneg %p1892_p12 }
  0x28   : > { %680 = vmatpush.msrb.mxu0 %v649_v39  ;;  %810 = vmatpush.msrb.mxu1 %v762_v50 }
  0x29   : > { %618 = vmatpush.msrb.mxu2 %v543_v51  ;;  %641 = vmatpush.msrb.mxu3 %v547_v52  ;;  %p1898_p3 = pnand %p1897_p2, %p1893_p13 }
  0x2a   : > { %811 = vmatpush.msrb.mxu1 %v761_v55 }
  0x8f   : > { %v476_v11 = vpop.xlane.xlu0 %475 }
  0x90   : > { %v487_v12 = vmul.f32 %v2076_v10, %v476_v11  ;;  %v760_v11 = vld [vmem:[%s2515_s3 + $0x18] sm:$0xff] }
  0x92   : > { %v2080_v13 = vsub.f32 %v2068_v0, %v487_v12 }
  0x94   : > { %v491_v14 = vmul.f32 %v2080_v13, %v2080_v13 }
  0x96   : > { %v493_v15 = vsel %vm473_vm0, %v491_v14, 0.0  ;;  %v660_v14 = vld [vmem:[%s2514_s2 + $0x58] sm:$0xff] }
  0x97   : > { %494 = vadd.xlane.f32.xlu1 %v493_v15  ;;  %v479_v16 = vpop.xlane.xlu0 %478 }
  0x98   : > { %v488_v17 = vmul.f32 %v2076_v10, %v479_v16  ;;  %v659_v16 = vld [vmem:[%s2514_s2 + $0x50] sm:$0xff] }
  0x9a   : > { %v2087_v18 = vsub.f32 %v2072_v2, %v488_v17 }
  0x9c   : > { %v492_v19 = vmul.f32 %v2087_v18, %v2087_v18 }
  0x9e   : > { %v496_v20 = vsel %vm473_vm0, %v492_v19, 0.0  ;;  %v758_v19 = vld [vmem:[%s2515_s3 + $0x8] sm:$0xff] }
  0x9f   : > { %497 = vadd.xlane.f32.xlu1 %v496_v20  ;;  %v658_v20 = vld [vmem:[%s2514_s2 + $0x48] sm:$0xff] }
 0x10a   : > { %v495_v34 = vpop.xlane.xlu1 %494 }
 0x10b   : > { %v499_v36 = vmul.f32 %v495_v34, %v2076_v10  ;;  %v765_v34 = vld [vmem:[%s2515_s3 + $0x40] sm:$0xff] }
 0x10d   : > { %v501_v38 = vadd.f32 1e-05, %v499_v36 }
 0x10f   : > { %1834 = vrsqrt.f32 %v501_v38  ;;  %vm509_vm3 = vweird.f32 %v501_v38 }
 0x112   : > { %v498_v46 = vpop.xlane.xlu1 %497 }
 0x113   : > { %v500_v49 = vmul.f32 %v498_v46, %v2076_v10 }
 0x115   : > { %v1835_v53 = vpop.eup %1834  ;;  %v502_v54 = vadd.f32 1e-05, %v500_v49 }
 0x116   : > { %v504_v56 = vmul.f32 %v1835_v53, %v501_v38  ;;  %vm510_vm2 = vweird.f32 %v1835_v53 }
 0x117   : > { %1836 = vrsqrt.f32 %v502_v54  ;;  %vm511_vm4 = vmor %vm509_vm3, %vm510_vm2  ;;  %vm519_vm6 = vweird.f32 %v502_v54 }
 0x118   : > { %v505_v57 = vmul.f32 %v1835_v53, %v504_v56 }
 0x11a   : > { %v506_v58 = vmul.f32 0.5, %v505_v57 }
 0x11c   : > { %v507_v59 = vsub.f32 1.5, %v506_v58 }
 0x11d   : > { %v1837_v60 = vpop.eup %1836 }
 0x11e   : > { %v508_v61 = vmul.f32 %v1835_v53, %v507_v59  ;;  %v514_v62 = vmul.f32 %v1837_v60, %v502_v54  ;;  %vm520_vm5 = vweird.f32 %v1837_v60 }
 0x11f   : > { %vm521_vm7 = vmor %vm519_vm6, %vm520_vm5 }
 0x120   : > { %v512_v1 = vsel %vm511_vm4, %v1835_v53, %v508_v61  ;;  %v515_v3 = vmul.f32 %v1837_v60, %v514_v62 }
 0x121   : > { %v523_v5 = vmul.f32 %v512_v1, %v2080_v13  ;;  %v759_v13 = vld [vmem:[%s2515_s3 + $0x10] sm:$0xff] }
 0x122   : > { %v516_v6 = vmul.f32 0.5, %v515_v3 }
 0x123   : > { %v528_v7 = vmul.f32 %v1825_v63, %v523_v5 }
 0x124   : > { %v517_v8 = vsub.f32 1.5, %v516_v6 }
 0x125   : > { %v2185_v9 = vadd.f32 %v1826_v4, %v528_v7 }
 0x126   : > { %v518_v12 = vmul.f32 %v1837_v60, %v517_v8 }
 0x127   : > { %1715 = vmatmul.msk.f32.vlgmr.msra.gmra.mxu0 %vm473_vm0, %v2185_v9  ;;  %1717 = vmatmul.msk.f32.vlgmr.msra.gmra.mxu2 %vm473_vm0, %v2185_v9 }
 0x128   : > { %v522_v15 = vsel %vm521_vm7, %v1837_v60, %v518_v12  ;;  %1725 = vmatmul.msk.f32.vlgmr.msra.gmra.mxu1 %vm473_vm0, %v2185_v9  ;;  %785 = vmatpush.msra.mxu0 %v760_v11 }
 0x129   : > { %v524_v17 = vmul.f32 %v522_v15, %v2087_v18  ;;  %723 = vmatpush.msra.mxu2 %v660_v14  ;;  %v664_v18 = vld [vmem:[%s2514_s2 + $0x78] sm:$0xff] }
 0x12a   : > { %786 = vmatpush.msra.mxu0 %v759_v13 }
 0x12b   : > { %v529_v21 = vmul.f32 %v1825_v63, %v524_v17  ;;  %724 = vmatpush.msra.mxu2 %v659_v16 }
 0x12c   : > { %787 = vmatpush.msra.mxu0 %v758_v19 }
 0x12d   : > { %v534_v23 = vadd.f32 %v1826_v4, %v529_v21  ;;  %725 = vmatpush.msra.mxu2 %v658_v20 }
 0x12e   : > { %788 = vmatpush.msra.mxu0 %v757_v22 }
 0x12f   : > { %1716 = vmatmul.msk.f32.vlgmr.msra.gmra.mxu3 %vm473_vm0, %v534_v23  ;;  %1718 = vmatmul.msk.f32.gmra.mxu2 %vm473_vm0, %v534_v23 }
 0x130   : > { %1723 = vmatmul.msk.f32.vlgmr.msrb.gmra.mxu0 %vm473_vm0, %v2185_v9  ;;  %1726 = vmatmul.msk.f32.gmra.mxu1 %vm473_vm0, %v534_v23 }
 0x131   : > { %746 = vmatpush.msra.mxu3 %v664_v18  ;;  %726 = vmatpush.msra.mxu2 %v657_v24 }
 0x133   : > { %747 = vmatpush.msra.mxu3 %v663_v25 }
 0x135   : > { %748 = vmatpush.msra.mxu3 %v662_v26 }
 0x137   : > { %1719 = vmatmul.msk.f32.vlgmr.msrb.gmra.mxu2 %vm473_vm0, %v2185_v9  ;;  %1721 = vmatmul.msk.f32.vlgmr.msrb.gmra.mxu3 %vm473_vm0, %v2185_v9 }
 0x138   : > { %1724 = vmatmul.msk.f32.gmra.mxu0 %vm473_vm0, %v534_v23  ;;  %1733 = vmatmul.msk.f32.vlgmr.msrb.gmra.mxu1 %vm473_vm0, %v2185_v9 }
 0x139   : > { %749 = vmatpush.msra.mxu3 %v661_v27  ;;  %831 = vmatpush.msrb.mxu2 %v768_v28 }
 0x13b   : > { %854 = vmatpush.msrb.mxu3 %v772_v29  ;;  %832 = vmatpush.msrb.mxu2 %v767_v30 }
 0x13d   : > { %855 = vmatpush.msrb.mxu3 %v771_v31  ;;  %833 = vmatpush.msrb.mxu2 %v766_v32 }
 0x13f   : > { %856 = vmatpush.msrb.mxu3 %v770_v33  ;;  %1720 = vmatmul.msk.f32.gmra.mxu2 %vm473_vm0, %v534_v23 }
 0x140   : > { %1722 = vmatmul.msk.f32.gmra.mxu3 %vm473_vm0, %v534_v23  ;;  %1731 = vmatmul.msk.f32.vlgmr.msra.gmra.mxu0 %vm473_vm0, %v2185_v9 }
 0x141   : > { %1734 = vmatmul.msk.f32.gmra.mxu1 %vm473_vm0, %v534_v23  ;;  %834 = vmatpush.msrb.mxu2 %v765_v34 }
 0x142   : > { %857 = vmatpush.msrb.mxu3 %v769_v35 }
 0x147   : > { %1727 = vmatmul.msk.f32.vlgmr.msra.gmra.mxu2 %vm473_vm0, %v2185_v9 }
 0x148   : > { %1729 = vmatmul.msk.f32.vlgmr.msra.gmra.mxu3 %vm473_vm0, %v2185_v9  ;;  %1732 = vmatmul.msk.f32.gmra.mxu0 %vm473_vm0, %v534_v23 }
 0x14f   : > { %1728 = vmatmul.msk.f32.gmra.mxu2 %vm473_vm0, %v534_v23 }
 0x150   : > { %1730 = vmatmul.msk.f32.gmra.mxu3 %vm473_vm0, %v534_v23 }
 0x157   : > { %1735 = vmatmul.msk.f32.vlgmr.msrb.gmra.mxu2 %vm473_vm0, %v2185_v9 }
 0x158   : > { %1737 = vmatmul.msk.f32.vlgmr.msrb.gmra.mxu3 %vm473_vm0, %v2185_v9 }
 0x15f   : > { %1736 = vmatmul.msk.f32.gmra.mxu2 %vm473_vm0, %v534_v23 }
 0x160   : > { %1738 = vmatmul.msk.f32.gmra.mxu3 %vm473_vm0, %v534_v23 }
 0x1a4   : > { %v574_v36 = vpop.f32.mrf.mxu0 }
 0x1a5   : > { %v705_v37 = vpop.f32.mrf.mxu1 }
 0x1a6   : > { %1741 = vmatpush.xpose.msk.msra.mxu1 %vm865_vm8, %v705_v37 }
 0x1aa   : > { %v597_v38 = vpop.f32.mrf.mxu2 }
 0x1ab   : > { %1742 = vmatmul.msk.f32.vlgmr.msra.gmra.mxu1 %vm865_vm8, %v597_v38 }
 0x1ad   : > { %v682_v39 = vpop.f32.mrf.mxu0  ;;  %v708_v40 = vpop.f32.mrf.mxu1 }
 0x1ae   : > { %1739 = vmatpush.xpose.msk.msrb.mxu0 %vm865_vm8, %v682_v39 }
 0x1b1   : > { %1740 = vmatmul.msk.f32.vlgmr.msrb.gmra.mxu0 %vm865_vm8, %v574_v36 }
 0x1b2   : > { %v2288_v41 = vpop.f32.mrf.mxu3  ;;  %v2290_v42 = vpop.f32.mrf.mxu2 }
 0x1b5   : > { %v685_v43 = vpop.f32.mrf.mxu0  ;;  %v813_v44 = vpop.f32.mrf.mxu1 }
 0x1b6   : > { %1055 = vmatpush.msrb.mxu1 %v813_v44 }
 0x1b8   : > { %1753 = vmatpush.xpose.msk.msra.mxu1 %vm865_vm8, %v708_v40 }
 0x1ba   : > { %v620_v45 = vpop.f32.mrf.mxu2  ;;  %v643_v46 = vpop.f32.mrf.mxu3 }
 0x1bd   : > { %v790_v47 = vpop.f32.mrf.mxu0 }
 0x1be   : > { %1032 = vmatpush.msra.mxu0 %v790_v47  ;;  %v2304_v56 = vpop.f32.mrf.mxu1 }
 0x1c0   : > { %1751 = vmatpush.xpose.msk.msrb.mxu0 %vm865_vm8, %v685_v43 }
 0x1c2   : > { %v2294_v48 = vpop.f32.mrf.mxu2 }
 0x1c3   : > { %v2296_v49 = vpop.f32.mrf.mxu3 }
 0x1c5   : > { %v793_v57 = vpop.f32.mrf.mxu0 }
 0x1ca   : > { %v728_v50 = vpop.f32.mrf.mxu2 }
 0x1cb   : > { %v751_v51 = vpop.f32.mrf.mxu3  ;;  %1743 = vmatpush.xpose.msk.msra.mxu2 %vm865_vm8, %v728_v50 }
 0x1cc   : > { %1745 = vmatpush.xpose.msk.msra.mxu3 %vm865_vm8, %v751_v51 }
 0x1ce   : > { %1744 = vmatmul.msk.f32.vlgmr.msra.gmra.mxu2 %vm865_vm8, %v620_v45 }
 0x1cf   : > { %1746 = vmatmul.msk.f32.vlgmr.msra.gmra.mxu3 %vm865_vm8, %v643_v46 }
 0x1d2   : > { %v731_v52 = vpop.f32.mrf.mxu2 }
 0x1d3   : > { %v754_v53 = vpop.f32.mrf.mxu3 }
 0x1da   : > { %v836_v54 = vpop.f32.mrf.mxu2 }
 0x1db   : > { %v859_v55 = vpop.f32.mrf.mxu3  ;;  %1078 = vmatpush.msrb.mxu2 %v836_v54 }
 0x1dc   : > { %1101 = vmatpush.msrb.mxu3 %v859_v55 }
 0x1dd   : > { %1755 = vmatpush.xpose.msk.msra.mxu2 %vm865_vm8, %v731_v52 }
 0x1de   : > { %1757 = vmatpush.xpose.msk.msra.mxu3 %vm865_vm8, %v754_v53 }
 0x1e2   : > { %v839_v62 = vpop.f32.mrf.mxu2 }
 0x1e3   : > { %v862_v63 = vpop.f32.mrf.mxu3 }
 0x228   : > { %v915_v58 = vpop.f32.mrf.mxu1 }
 0x229   : > { %v973_v59 = vsel %vm865_vm8, %v915_v58, -inf }
 0x22a   : > { %974 = vmax.xlane.f32.xlu1 %v973_v59 }
 0x22e   : > { %v889_v60 = vpop.f32.mrf.mxu0 }
 0x22f   : > { %v970_v61 = vsel %vm865_vm8, %v889_v60, -inf }
 0x230   : > { %971 = vmax.xlane.f32.xlu0 %v970_v61 }
 0x251   : > { %v941_v1 = vpop.f32.mrf.mxu2 }
 0x252   : > { %v976_v3 = vsel %vm865_vm8, %v941_v1, -inf  ;;  %v967_v4 = vpop.f32.mrf.mxu3 }
 0x253   : > { %977 = vmax.xlane.f32.xlu2 %v976_v3  ;;  %v979_v5 = vsel %vm865_vm8, %v967_v4, -inf }
 0x25b   : > { %980 = vmax.xlane.f32.xlu2 %v979_v5 }
 0x29d   : > { %v975_v12 = vpop.xlane.xlu1 %974 }
 0x29e   : > { %v983_v15 = vsub.f32 %v915_v58, %v975_v12 }
 0x2a0   : > { %v988_v17 = vmul.f32 1.442695, %v983_v15  ;;  %v1347_v15 = vld [vmem:[%s2516_s4 + $0x8] sm:$0xff] }
 0x2a3   : > { %v972_v6 = vpop.xlane.xlu0 %971 }
 0x2a4   : > { %v982_v7 = vsub.f32 %v889_v60, %v972_v6 }
 0x2a6   : > { %v986_v8 = vmul.f32 1.442695, %v982_v7 }
 0x2a8   : > { %1838 = vpow2.f32 %v986_v8 }
 0x2ae   : > { %v1839_v9 = vpop.eup %1838 }
 0x2af   : > { %v994_v11 = vsel %vm865_vm8, %v1839_v9, 0.0 }
 0x2b0   : > { %995 = vadd.xlane.f32.xlu1 %v994_v11 }
 0x2c6   : > { %v978_v14 = vpop.xlane.xlu2 %977 }
 0x2c7   : > { %v984_v13 = vsub.f32 %v941_v1, %v978_v14 }
 0x2c9   : > { %v990_v16 = vmul.f32 1.442695, %v984_v13  ;;  %v1348_v13 = vld [vmem:[%s2516_s4 + $0x10] sm:$0xff] }
 0x2cb   : > { %1840 = vpow2.f32 %v990_v16  ;;  %v1349_v16 = vld [vmem:[%s2516_s4 + $0x18] sm:$0xff] }
 0x2cc   : > { %1842 = vpow2.f32 %v988_v17 }
 0x2ce   : > { %v981_v19 = vpop.xlane.xlu2 %980 }
 0x2cf   : > { %v985_v20 = vsub.f32 %v967_v4, %v981_v19 }
 0x2d1   : > { %v1841_v21 = vpop.eup %1840  ;;  %v992_v22 = vmul.f32 1.442695, %v985_v20 }
 0x2d2   : > { %v1000_v23 = vsel %vm865_vm8, %v1841_v21, 0.0  ;;  %v1843_v18 = vpop.eup %1842 }
 0x2d3   : > { %1844 = vpow2.f32 %v992_v22  ;;  %1001 = vadd.xlane.f32.xlu2 %v1000_v23  ;;  %v997_v25 = vsel %vm865_vm8, %v1843_v18, 0.0 }
 0x2d9   : > { %v1845_v24 = vpop.eup %1844 }
 0x2da   : > { %v1003_v26 = vsel %vm865_vm8, %v1845_v24, 0.0 }
 0x2db   : > { %998 = vadd.xlane.f32.xlu2 %v997_v25  ;;  %1004 = vadd.xlane.f32.xlu0 %v1003_v26 }
 0x323   : > { %v996_v27 = vpop.xlane.xlu1 %995 }
 0x324   : > { %1846 = vrcp.f32 %v996_v27 }
 0x32a   : > { %v1847_v28 = vpop.eup %1846 }
 0x32b   : > { %v1010_v29 = vmul.f32 %v1847_v28, %v1839_v9  ;;  %v1346_v9 = vld [vmem:[%s2516_s4] sm:$0xff] }
 0x32d   : > { %1747 = vmatmul.msk.f32.vlgmr.msra.gmra.mxu0 %vm865_vm8, %v1010_v29 }
 0x32e   : > { %1272 = vmatpush.msra.mxu0 %v793_v57 }
 0x335   : > { %1752 = vmatmul.msk.f32.vlgmr.msrb.gmra.mxu0 %vm865_vm8, %v2288_v41 }
 0x336   : > { %1371 = vmatpush.msrb.mxu0 %v1346_v9 }
 0x346   : > { %v1002_v30 = vpop.xlane.xlu2 %1001 }
 0x347   : > { %1848 = vrcp.f32 %v1002_v30 }
 0x34d   : > { %v1849_v31 = vpop.eup %1848 }
 0x34e   : > { %v1012_v32 = vmul.f32 %v1849_v31, %v1841_v21  ;;  %v1005_v33 = vpop.xlane.xlu0 %1004  ;;  %v999_v34 = vpop.xlane.xlu2 %998 }
 0x34f   : > { %1850 = vrcp.f32 %v1005_v33 }
 0x350   : > { %1852 = vrcp.f32 %v999_v34  ;;  %1749 = vmatmul.msk.f32.vlgmr.msrb.gmra.mxu2 %vm865_vm8, %v1012_v32 }
 0x351   : > { %1318 = vmatpush.msrb.mxu2 %v839_v62 }
 0x355   : > { %v1851_v35 = vpop.eup %1850 }
 0x356   : > { %v1853_v36 = vpop.eup %1852  ;;  %v1013_v37 = vmul.f32 %v1851_v35, %v1845_v24 }
 0x357   : > { %v1011_v38 = vmul.f32 %v1853_v36, %v1843_v18 }
 0x358   : > { %1750 = vmatmul.msk.f32.vlgmr.msrb.gmra.mxu3 %vm865_vm8, %v1013_v37  ;;  %1756 = vmatmul.msk.f32.vlgmr.msra.gmra.mxu2 %vm865_vm8, %v2294_v48 }
 0x359   : > { %1748 = vmatmul.msk.f32.vlgmr.msrb.gmra.mxu1 %vm865_vm8, %v1011_v38  ;;  %1341 = vmatpush.msrb.mxu3 %v862_v63 }
 0x35a   : > { %1295 = vmatpush.msrb.mxu1 %v2304_v56  ;;  %1429 = vmatpush.msra.mxu2 %v1348_v13 }
 0x360   : > { %1758 = vmatmul.msk.f32.vlgmr.msra.gmra.mxu3 %vm865_vm8, %v2296_v49 }
 0x361   : > { %1754 = vmatmul.msk.f32.vlgmr.msra.gmra.mxu1 %vm865_vm8, %v2290_v42  ;;  %1458 = vmatpush.msra.mxu3 %v1349_v16 }
 0x362   : > { %1400 = vmatpush.msra.mxu1 %v1347_v15 }
 0x3aa   : > { %v1034_v39 = vpop.f32.mrf.mxu0 }
 0x3b2   : > { %v1129_v40 = vpop.f32.mrf.mxu0 }
 0x3b3   : > { %v1210_v41 = vsel %vm865_vm8, %v1129_v40, -inf }
 0x3b4   : > { %1211 = vmax.xlane.f32.xlu2 %v1210_v41 }
 0x3d3   : > { %v2328_v43 = vpop.f32.mrf.mxu2 }
 0x3d6   : > { %v2330_v44 = vpop.f32.mrf.mxu1 }
 0x3db   : > { %v2332_v45 = vpop.f32.mrf.mxu3  ;;  %v1181_v46 = vpop.f32.mrf.mxu2 }
 0x3dc   : > { %v1216_v47 = vsel %vm865_vm8, %v1181_v46, -inf }
 0x3dd   : > { %1217 = vmax.xlane.f32.xlu0 %v1216_v47 }
 0x3de   : > { %v1155_v48 = vpop.f32.mrf.mxu1 }
 0x3df   : > { %v1213_v42 = vsel %vm865_vm8, %v1155_v48, -inf }
 0x3e3   : > { %v1207_v49 = vpop.f32.mrf.mxu3 }
 0x3e4   : > { %v1219_v50 = vsel %vm865_vm8, %v1207_v49, -inf }
 0x3e5   : > { %1220 = vmax.xlane.f32.xlu1 %v1219_v50  ;;  %1214 = vmax.xlane.f32.xlu0 %v1213_v42 }
 0x427   : > { %v1212_v51 = vpop.xlane.xlu2 %1211 }
 0x428   : > { %v1222_v52 = vsub.f32 %v1129_v40, %v1212_v51 }
 0x42a   : > { %v1226_v53 = vmul.f32 1.442695, %v1222_v52 }
 0x42c   : > { %1854 = vpow2.f32 %v1226_v53 }
 0x432   : > { %v1855_v54 = vpop.eup %1854 }
 0x433   : > { %v1234_v55 = vsel %vm865_vm8, %v1855_v54, 0.0 }
 0x434   : > { %1235 = vadd.xlane.f32.xlu0 %v1234_v55 }
 0x450   : > { %v1218_v56 = vpop.xlane.xlu0 %1217 }
 0x451   : > { %v1224_v57 = vsub.f32 %v1181_v46, %v1218_v56 }
 0x453   : > { %v1230_v58 = vmul.f32 1.442695, %v1224_v57 }
 0x455   : > { %1856 = vpow2.f32 %v1230_v58 }
 0x458   : > { %v1221_v59 = vpop.xlane.xlu1 %1220  ;;  %v1215_v60 = vpop.xlane.xlu0 %1214 }
 0x459   : > { %v1225_v61 = vsub.f32 %v1207_v49, %v1221_v59  ;;  %v1223_v62 = vsub.f32 %v1155_v48, %v1215_v60 }
 0x45b   : > { %v1857_v63 = vpop.eup %1856  ;;  %v1232_v1 = vmul.f32 1.442695, %v1225_v61  ;;  %v1228_v3 = vmul.f32 1.442695, %v1223_v62 }
 0x45c   : > { %v1240_v4 = vsel %vm865_vm8, %v1857_v63, 0.0 }
 0x45d   : > { %1858 = vpow2.f32 %v1232_v1  ;;  %1241 = vadd.xlane.f32.xlu1 %v1240_v4  ;;  %v1546_v1 = vld [vmem:[%s2522_s10 + $0x10] sm:$0xff] }
 0x45e   : > { %1860 = vpow2.f32 %v1228_v3  ;;  %v1544_v3 = vld [vmem:[%s2522_s10] sm:$0xff] }
 0x463   : > { %v1859_v5 = vpop.eup %1858 }
 0x464   : > { %v1861_v6 = vpop.eup %1860  ;;  %v1243_v7 = vsel %vm865_vm8, %v1859_v5, 0.0 }
 0x465   : > { %1244 = vadd.xlane.f32.xlu2 %v1243_v7  ;;  %v1237_v8 = vsel %vm865_vm8, %v1861_v6, 0.0 }
 0x466   : > { %1238 = vadd.xlane.f32.xlu1 %v1237_v8 }
 0x4a7   : > { %v1236_v11 = vpop.xlane.xlu0 %1235 }
 0x4a8   : > { %1862 = vrcp.f32 %v1236_v11 }
 0x4ae   : > { %v1863_v12 = vpop.eup %1862 }
 0x4af   : > { %v1250_v14 = vmul.f32 %v1863_v12, %v1855_v54 }
 0x4b1   : > { %1759 = vmatmul.msk.f32.vlgmr.msra.gmra.mxu0 %vm865_vm8, %v1250_v14 }
 0x4b9   : > { %1763 = vmatmul.msk.f32.vlgmr.msrb.gmra.mxu0 %vm865_vm8, %v1034_v39  ;;  %v1827_v39 = vld [vmem:[%s2517_s5] ss:$0 sm:$0xff] }
 0x4d0   : > { %v1242_v17 = vpop.xlane.xlu1 %1241 }
 0x4d1   : > { %1864 = vrcp.f32 %v1242_v17 }
 0x4d7   : > { %v1865_v19 = vpop.eup %1864 }
 0x4d8   : > { %v1252_v20 = vmul.f32 %v1865_v19, %v1857_v63  ;;  %v1245_v21 = vpop.xlane.xlu2 %1244  ;;  %v1547_v63 = vld [vmem:[%s2522_s10 + $0x18] sm:$0xff] }
 0x4d9   : > { %v1239_v22 = vpop.xlane.xlu1 %1238  ;;  %1866 = vrcp.f32 %v1245_v21  ;;  %1570 = vmatpush.msra.mxu0 %v1547_v63 }
 0x4da   : > { %1868 = vrcp.f32 %v1239_v22  ;;  %1761 = vmatmul.msk.f32.vlgmr.msrb.gmra.mxu2 %vm865_vm8, %v1252_v20  ;;  %v1828_v20 = vld [vmem:[%s2520_s8] ss:$0 sm:$0xff] }
 0x4db   : > { %1571 = vmatpush.msra.mxu0 %v1546_v1 }
 0x4df   : > { %v1867_v23 = vpop.eup %1866 }
 0x4e0   : > { %v1869_v18 = vpop.eup %1868  ;;  %v1253_v24 = vmul.f32 %v1867_v23, %v1859_v5  ;;  %v1829_v23 = vld [vmem:[%s2521_s9] ss:$0 sm:$0xff] }
 0x4e1   : > { %v1251_v25 = vmul.f32 %v1869_v18, %v1861_v6 }
 0x4e2   : > { %1762 = vmatmul.msk.f32.vlgmr.msrb.gmra.mxu3 %vm865_vm8, %v1253_v24  ;;  %1767 = vmatmul.msk.f32.vlgmr.msra.gmra.mxu2 %vm865_vm8, %v2328_v43 }
 0x4e3   : > { %1760 = vmatmul.msk.f32.vlgmr.msrb.gmra.mxu1 %vm865_vm8, %v1251_v25  ;;  %v1598_v25 = vld [vmem:[%s2524_s12 + $0x78] sm:$0xff] }
 0x4e4   : > { %1603 = vmatpush.msrb.mxu1 %v1598_v25 }
 0x4ea   : > { %1769 = vmatmul.msk.f32.vlgmr.msra.gmra.mxu3 %vm865_vm8, %v2332_v45 }
 0x4eb   : > { %1765 = vmatmul.msk.f32.vlgmr.msra.gmra.mxu1 %vm865_vm8, %v2330_v44 }
 0x52e   : > { %v1274_v26 = vpop.f32.mrf.mxu0 }
 0x52f   : > { %1764 = vmatmul.msk.f32.gmra.mxu0 %vm865_vm8, %v1274_v26  ;;  %v1597_v26 = vld [vmem:[%s2524_s12 + $0x70] sm:$0xff] }
 0x530   : > { %1604 = vmatpush.msrb.mxu1 %v1597_v26 }
 0x536   : > { %v1373_v30 = vpop.f32.mrf.mxu0 }
 0x537   : > { %v1466_v32 = vsel %vm473_vm0, %v1373_v30, 0.0  ;;  %v1593_v30 = vld [vmem:[%s2524_s12 + $0x50] sm:$0xff] }
 0x55d   : > { %v1320_v27 = vpop.f32.mrf.mxu2 }
 0x55e   : > { %1768 = vmatmul.msk.f32.gmra.mxu2 %vm865_vm8, %v1320_v27  ;;  %v1596_v27 = vld [vmem:[%s2524_s12 + $0x68] sm:$0xff] }
 0x55f   : > { %1605 = vmatpush.msrb.mxu1 %v1596_v27 }
 0x560   : > { %v1297_v28 = vpop.f32.mrf.mxu1 }
 0x561   : > { %1766 = vmatmul.msk.f32.gmra.mxu1 %vm865_vm8, %v1297_v28  ;;  %v1595_v28 = vld [vmem:[%s2524_s12 + $0x60] sm:$0xff] }
 0x562   : > { %1606 = vmatpush.msrb.mxu1 %v1595_v28 }
 0x565   : > { %v1343_v29 = vpop.f32.mrf.mxu3  ;;  %v1431_v33 = vpop.f32.mrf.mxu2 }
 0x566   : > { %1770 = vmatmul.msk.f32.gmra.mxu3 %vm865_vm8, %v1343_v29  ;;  %v1469_v36 = vsel %vm473_vm0, %v1431_v33, 0.0  ;;  %v1594_v29 = vld [vmem:[%s2524_s12 + $0x58] sm:$0xff] }
 0x567   : > { %1607 = vmatpush.msrb.mxu1 %v1594_v29  ;;  %v1590_v33 = vld [vmem:[%s2524_s12 + $0x38] sm:$0xff] }
 0x568   : > { %v1402_v31 = vpop.f32.mrf.mxu1 }
 0x569   : > { %v1467_v34 = vsel %vm473_vm0, %v1402_v31, 0.0  ;;  %1608 = vmatpush.msrb.mxu1 %v1593_v30  ;;  %v1592_v31 = vld [vmem:[%s2524_s12 + $0x48] sm:$0xff] }
 0x56a   : > { %v1468_v35 = vadd.f32 %v1467_v34, %v1466_v32  ;;  %v1591_v32 = vld [vmem:[%s2524_s12 + $0x40] sm:$0xff]  ;;  %v1589_v34 = vld [vmem:[%s2524_s12 + $0x30] sm:$0xff] }
 0x56b   : > { %1609 = vmatpush.msrb.mxu1 %v1592_v31 }
 0x56c   : > { %v1470_v38 = vadd.f32 %v1469_v36, %v1468_v35  ;;  %v1588_v35 = vld [vmem:[%s2524_s12 + $0x28] sm:$0xff]  ;;  %v1587_v36 = vld [vmem:[%s2524_s12 + $0x20] sm:$0xff] }
 0x56d   : > { %v1460_v37 = vpop.f32.mrf.mxu3  ;;  %1610 = vmatpush.msrb.mxu1 %v1591_v32 }
 0x56e   : > { %v1471_v40 = vsel %vm473_vm0, %v1460_v37, 0.0  ;;  %v1586_v37 = vld [vmem:[%s2524_s12 + $0x18] sm:$0xff] }
 0x56f   : > { %v1472_v41 = vadd.f32 %v1471_v40, %v1470_v38  ;;  %1611 = vmatpush.msrb.mxu1 %v1590_v33  ;;  %v1585_v38 = vld [vmem:[%s2524_s12 + $0x10] sm:$0xff] }
 0x571   : > { %v1484_v43 = vadd.f32 %v1827_v39, %v1472_v41  ;;  %1612 = vmatpush.msrb.mxu1 %v1589_v34  ;;  %v1584_v41 = vld [vmem:[%s2524_s12 + $0x8] sm:$0xff] }
 0x573   : > { %v2376_v44 = vadd.f32 %v1484_v43, %v2068_v0  ;;  %1613 = vmatpush.msrb.mxu1 %v1588_v35  ;;  %v1583_v43 = vld [vmem:[%s2524_s12] sm:$0xff] }
 0x575   : > { %v1490_v45 = vsel %vm473_vm0, %v2376_v44, 0.0  ;;  %1614 = vmatpush.msrb.mxu1 %v1587_v36 }
 0x576   : > { %1491 = vadd.xlane.f32.xlu2 %v1490_v45 }
 0x577   : > { %1615 = vmatpush.msrb.mxu1 %v1586_v37 }
 0x579   : > { %1616 = vmatpush.msrb.mxu1 %v1585_v38 }
 0x57b   : > { %1617 = vmatpush.msrb.mxu1 %v1584_v41 }
 0x57d   : > { %1618 = vmatpush.msrb.mxu1 %v1583_v43 }
 0x5ac   : > { %v1376_v47 = vpop.f32.mrf.mxu0 }
 0x5ad   : > { %v1473_v50 = vsel %vm473_vm0, %v1376_v47, 0.0 }
 0x5de   : > { %v1405_v46 = vpop.f32.mrf.mxu1 }
 0x5df   : > { %v1474_v49 = vsel %vm473_vm0, %v1405_v46, 0.0 }
 0x5e0   : > { %v1475_v51 = vadd.f32 %v1474_v49, %v1473_v50 }
 0x5e1   : > { %v1434_v48 = vpop.f32.mrf.mxu2 }
 0x5e2   : > { %v1476_v42 = vsel %vm473_vm0, %v1434_v48, 0.0 }
 0x5e3   : > { %v1477_v52 = vadd.f32 %v1476_v42, %v1475_v51 }
 0x5e9   : > { %v1492_v53 = vpop.xlane.xlu2 %1491  ;;  %v1463_v54 = vpop.f32.mrf.mxu3 }
 0x5ea   : > { %v1496_v0 = vmul.f32 %v1492_v53, %v2076_v10  ;;  %v1478_v55 = vsel %vm473_vm0, %v1463_v54, 0.0  ;;  %v1830_v54 = vld [vmem:[%s2523_s11] ss:$0 sm:$0xff] }
 0x5eb   : > { %v1479_v56 = vadd.f32 %v1478_v55, %v1477_v52 }
 0x5ec   : > { %v1498_v57 = vsub.f32 %v2376_v44, %v1496_v0 }
 0x5ed   : > { %v1485_v58 = vadd.f32 %v1827_v39, %v1479_v56 }
 0x5ee   : > { %v1500_v59 = vmul.f32 %v1498_v57, %v1498_v57 }
 0x5ef   : > { %v2387_v60 = vadd.f32 %v1485_v58, %v2072_v2  ;;  %v1545_v2 = vld [vmem:[%s2522_s10 + $0x8] sm:$0xff] }
 0x5f0   : > { %v1502_v61 = vsel %vm473_vm0, %v1500_v59, 0.0  ;;  %1572 = vmatpush.msra.mxu0 %v1545_v2 }
 0x5f1   : > { %1503 = vadd.xlane.f32.xlu1 %v1502_v61  ;;  %v1493_v62 = vsel %vm473_vm0, %v2387_v60, 0.0  ;;  %v1831_v61 = vld [vmem:[%s2525_s13] ss:$0 sm:$0xff] }
 0x5f2   : > { %1494 = vadd.xlane.f32.xlu0 %v1493_v62  ;;  %1573 = vmatpush.msra.mxu0 %v1544_v3 }
 0x664   : > { %v1504_v4 = vpop.xlane.xlu1 %1503 }
 0x665   : > { %v1508_v5 = vmul.f32 %v1504_v4, %v2076_v10  ;;  %v1495_v6 = vpop.xlane.xlu0 %1494 }
 0x666   : > { %v1497_v7 = vmul.f32 %v1495_v6, %v2076_v10 }
 0x667   : > { %v1510_v8 = vadd.f32 1e-05, %v1508_v5 }
 0x668   : > { %v2407_v9 = vsub.f32 %v2387_v60, %v1497_v7 }
 0x669   : > { %1870 = vrsqrt.f32 %v1510_v8  ;;  %vm1518_vm10 = vweird.f32 %v1510_v8 }
 0x66a   : > { %v1501_v11 = vmul.f32 %v2407_v9, %v2407_v9 }
 0x66c   : > { %v1505_v12 = vsel %vm473_vm0, %v1501_v11, 0.0 }
 0x66d   : > { %1506 = vadd.xlane.f32.xlu2 %v1505_v12 }
 0x66f   : > { %v1871_v14 = vpop.eup %1870 }
 0x670   : > { %v1513_v13 = vmul.f32 %v1871_v14, %v1510_v8  ;;  %vm1519_vm9 = vweird.f32 %v1871_v14 }
 0x671   : > { %vm1520_vm11 = vmor %vm1518_vm10, %vm1519_vm9 }
 0x672   : > { %v1514_v15 = vmul.f32 %v1871_v14, %v1513_v13 }
 0x674   : > { %v1515_v16 = vmul.f32 0.5, %v1514_v15 }
 0x676   : > { %v1516_v17 = vsub.f32 1.5, %v1515_v16 }
 0x678   : > { %v1517_v19 = vmul.f32 %v1871_v14, %v1516_v17 }
 0x67a   : > { %v1521_v21 = vsel %vm1520_vm11, %v1871_v14, %v1517_v19 }
 0x67b   : > { %v1532_v22 = vmul.f32 %v1521_v21, %v1498_v57 }
 0x67d   : > { %v1537_v18 = vmul.f32 %v1828_v20, %v1532_v22 }
 0x67f   : > { %v1542_v24 = vadd.f32 %v1829_v23, %v1537_v18 }
 0x681   : > { %1771 = vmatmul.msk.f32.vlgmr.msra.gmra.mxu0 %vm473_vm0, %v1542_v24 }
 0x6e0   : > { %v1507_v39 = vpop.xlane.xlu2 %1506 }
 0x6e1   : > { %v1509_v40 = vmul.f32 %v1507_v39, %v2076_v10 }
 0x6e3   : > { %v1511_v45 = vadd.f32 1e-05, %v1509_v40 }
 0x6e5   : > { %1872 = vrsqrt.f32 %v1511_v45  ;;  %vm1528_vm13 = vweird.f32 %v1511_v45 }
 0x6eb   : > { %v1873_v46 = vpop.eup %1872 }
 0x6ec   : > { %v1523_v47 = vmul.f32 %v1873_v46, %v1511_v45  ;;  %vm1529_vm12 = vweird.f32 %v1873_v46 }
 0x6ed   : > { %vm1530_vm14 = vmor %vm1528_vm13, %vm1529_vm12 }
 0x6ee   : > { %v1524_v48 = vmul.f32 %v1873_v46, %v1523_v47 }
 0x6f0   : > { %v1525_v49 = vmul.f32 0.5, %v1524_v48 }
 0x6f2   : > { %v1526_v50 = vsub.f32 1.5, %v1525_v49 }
 0x6f4   : > { %v1527_v10 = vmul.f32 %v1873_v46, %v1526_v50 }
 0x6f6   : > { %v1531_v42 = vsel %vm1530_vm14, %v1873_v46, %v1527_v10 }
 0x6f7   : > { %v1533_v51 = vmul.f32 %v1531_v42, %v2407_v9 }
 0x6f9   : > { %v1538_v52 = vmul.f32 %v1828_v20, %v1533_v51 }
 0x6fb   : > { %v1543_v53 = vadd.f32 %v1829_v23, %v1538_v52 }
 0x6fd   : > { %1772 = vmatmul.msk.f32.gmra.mxu0 %vm473_vm0, %v1543_v53 }
 0x6fe   : > { %v1575_v0 = vpop.f32.mrf.mxu0 }
 0x6ff   : > { %v1576_v55 = vadd.f32 %v1830_v54, %v1575_v0 }
 0x701   : > { %v1581_v56 = vmax.f32 %v1576_v55, 0.0 }
 0x703   : > { %1619 = vmatmul.f32.vlgmr.msrb.gmra.mxu1 %v1581_v56 }
 0x77a   : > { %v1578_v57 = vpop.f32.mrf.mxu0 }
 0x77b   : > { %v1579_v58 = vadd.f32 %v1830_v54, %v1578_v57 }
 0x77d   : > { %v1582_v59 = vmax.f32 %v1579_v58, 0.0 }
 0x77f   : > { %1622 = vmatmul.f32.gmra.mxu1 %v1582_v59 }
 0x780   : > { %v1620_v62 = vpop.f32.mrf.mxu1 }
 0x781   : > { %v1621_v63 = vadd.f32 %v1831_v61, %v1620_v62 }
 0x783   : > { %v1626_v1 = vadd.f32 %v1621_v63, %v2376_v44 }
 0x785   : > { %1628 = vst.msk [vmem:[%s461_s20] sm:$0xff] %vm473_vm0, %v1626_v1 }
 0x7fc   : > { %v1623_v2 = vpop.f32.mrf.mxu1 }
 0x7fd   : > { %v1624_v3 = vadd.f32 %v1831_v61, %v1623_v2 }
 0x7ff   : > { %v1627_v4 = vadd.f32 %v1624_v3, %v2387_v60 }
 0x801   : > { %1629 = vst.msk [vmem:[%s461_s20 + $0x8] sm:$0xff] %vm473_vm0, %v1627_v4 }
 0x802   : > { %1901 = shalt.err (!%p1898_p3)
}
 0x803   : > { %s1939_s0 = smov 128   ;;  %s1940_s20 = smov 8  }
 0x804   : > { %1783 = dma.vmem_to_hbm [thread:$0]  (%p2054_p5), %s1644_s28, 256, %s1646_s1, %s1631_s18, %s1939_s0, %s1939_s0, %s1940_s20  }
 0x805 PF: > { %p1789_p4 = scmp.ge.s32.totalorder %s1936_s16, 2  ;;  %s1660_s17 = sand.u32 1, %s1924_s29  }
 0x806   : > { %s1661_s21 = scalar_lea.sflag [#allocation3], %s1660_s17 }
 0x807   : > { %p1786_p7 = pnand %p1789_p4, %p2058_p6 }
 0x809   : > { %p1787_p8 = pneg %p1786_p7 }
 0x80b   : > { %1919 = dma.done.wait (%p1787_p8), %s1661_s21, 256  }
 0x80c   : > { %1921 = vsyncadd (%p1787_p8), %s1661_s21, 4294967040  ;;  %s2536_s15 = sld [smem:[#allocation5_spill]]  ;;  %p24_p9 = scmp.ge.s32.totalorder %s2041_s19, 4  }
 0x80d   : > { %s2537_s22 = sld [smem:[#allocation6_spill]]  ;;  %s2538_s29 = smov %s1928_s30 }
 0x80e   : > { %s2541_s16 = smov %s2041_s19 }
 0x80f   :  { %26 = sbr.rel (!%p24_p9) target bundleno = 6 (0x6), region = 111 }
 0x812   : > { %s2539_s30 = smov %s2536_s15 }
 0x813   : > { %s2540_s15 = smov %s2537_s22 }
 0x814   :  { %1667 = vsyncpa [#allocation3], 1 }
 0x815   :  { %1669 = vsyncpa [#allocation3 + $0x1], 1 }

</bundles_post_ra>
